<compile_context>
chip_gen: v7x
topology: tpu7x:2x2x1
jax: 0.10.0
libtpu: 0.0.40
codegen_flags: <defaults>
</compile_context>

<pallas_src>
import functools
import math

import jax
import jax.numpy as jnp
from jax import lax
from jax.experimental import pallas as pl
from jax.experimental.pallas import tpu as pltpu

_NEG_INF = -1e30     # Python float -> jaxpr literal (finite, NaN-proof mask value)


def _round_up(x, m):
    return ((x + m - 1) // m) * m


def _pick_tile(dim, target, align):
    """Largest divisor of `dim` that is <= target and a multiple of `align`.
    Falls back to the full dimension (always a legal block size)."""
    if dim <= target:
        return dim
    for t in range(target, align - 1, -1):
        if dim % t == 0 and t % align == 0:
            return t
    return dim


def _vmem_limit_bytes():
    """Generation-aware VMEM cap: ~75% of physical (96 MiB on v5e/v6e's
    128 MiB, 48 MiB on v7x's 64 MiB), clamped to [32, 100] MiB."""
    try:
        cap = int(pltpu.get_tpu_info().vmem_capacity_bytes)
    except Exception:                      # interpret mode / non-TPU fallback
        cap = 128 * 1024 * 1024
    return max(32 << 20, min(int(0.75 * cap), 100 << 20))


# ---------------------------------------------------------------------------
# Tiled linear projection: y = x @ W + b     (x: [M, Din], W: [Din, Dout])
# ---------------------------------------------------------------------------
def _linear_kernel(x_ref, w_ref, b_ref, o_ref, acc_ref):
    k = pl.program_id(2)

    @pl.when(k == 0)
    def _():
        acc_ref[...] = jnp.zeros_like(acc_ref)

    acc_ref[...] += jnp.dot(x_ref[...], w_ref[...],
                            preferred_element_type=jnp.float32)

    @pl.when(k == pl.num_programs(2) - 1)
    def _():
        o_ref[...] = (acc_ref[...] + b_ref[...].astype(jnp.float32)
                      ).astype(o_ref.dtype)


def linear(x, w, b, *, tm_target=512, tn_target=512, tk_target=512):
    """x: [M, Din], w: [Din, Dout], b: [Dout] -> [M, Dout]."""
    M, Din = x.shape
    Dout = w.shape[1]
    itemsize = x.dtype.itemsize
    align_m = 8 * max(1, 4 // itemsize)      # 8 f32 / 16 bf16 / 32 int8-fp8
    tm = _pick_tile(M, tm_target, align_m)   # sublane axis of x / out
    tn = _pick_tile(Dout, tn_target, 128)    # lane axis of w / out
    tk = _pick_tile(Din, tk_target, 128)     # contraction axis
    b2 = b.reshape(1, Dout)

    gm, gn, gk = M // tm, Dout // tn, Din // tk
    cost = pl.CostEstimate(
        flops=2 * M * Din * Dout,
        transcendentals=0,
        bytes_accessed=itemsize * (gn * M * Din + gm * Din * Dout + M * Dout),
    )

    return pl.pallas_call(
        _linear_kernel,
        out_shape=jax.ShapeDtypeStruct((M, Dout), x.dtype),
        grid=(gm, gn, gk),                               # reduction axis last
        in_specs=[
            pl.BlockSpec((tm, tk), lambda i, j, k: (i, k)),
            pl.BlockSpec((tk, tn), lambda i, j, k: (k, j)),
            pl.BlockSpec((1, tn), lambda i, j, k: (0, j)),
        ],
        out_specs=pl.BlockSpec((tm, tn), lambda i, j, k: (i, j)),
        scratch_shapes=[pltpu.VMEM((tm, tn), jnp.float32)],
        compiler_params=pltpu.CompilerParams(
            dimension_semantics=("parallel", "parallel", "arbitrary"),
            vmem_limit_bytes=_vmem_limit_bytes(),
        ),
        cost_estimate=cost,
    )(x, w, b2)


# ---------------------------------------------------------------------------
# Band-masked attention.  One grid step = one (batch, q-block), all heads.
# K/V stay in HBM; a `win`-wide banded window is DMA'd per q-block and
# double-buffered across q-blocks (primed at the start of every batch).
# ---------------------------------------------------------------------------
def _attn_kernel(q_ref, k_hbm, v_hbm, o_ref,
                 kbuf, vbuf, sem, oacc, *,
                 nhead, d_k, n_neighbor, seq_len, tq, win, num_q, pad,
                 full_window):
    b = pl.program_id(0)
    qi = pl.program_id(1)
    q0 = qi * tq                              # first global query row (tracer)

    def win_start(q_start):
        # Sublane-aligned window start covering all in-band columns for
        # query rows [q_start, q_start + tq).  Python path for static starts
        # (keeps concrete jax arrays out of the kernel jaxpr).
        if full_window:
            return 0
        if isinstance(q_start, int):
            return max(0, min(q_start - pad, seq_len - win))
        s0 = jnp.clip(q_start - pad, 0, seq_len - win)   # multiple of 8
        return pl.multiple_of(s0, 8)

    def make_copies(q_start, slot):
        s0 = win_start(q_start)
        kc = pltpu.make_async_copy(k_hbm.at[b, pl.ds(s0, win), :],
                                   kbuf.at[slot], sem.at[0, slot])
        vc = pltpu.make_async_copy(v_hbm.at[b, pl.ds(s0, win), :],
                                   vbuf.at[slot], sem.at[1, slot])
        return kc, vc

    if full_window:
        # Window == whole sequence: fetch K/V once per batch into slot 0.
        @pl.when(qi == 0)
        def _():
            kc, vc = make_copies(0, 0)
            kc.start(); vc.start()
            kc.wait(); vc.wait()
        slot = 0
        cur_start = 0
    else:
        slot = qi % 2

        @pl.when(qi == 0)                      # prime the per-batch pipeline
        def _():
            kc, vc = make_copies(0, 0)
            kc.start(); vc.start()

        # Wait on the current window (started here at qi==0, or by qi-1).
        kc, vc = make_copies(q0, slot)
        kc.wait(); vc.wait()

        # Prefetch next q-block's window into the other slot (overlaps the
        # compute below).
        @pl.when(qi + 1 < num_q)
        def _():
            kn, vn = make_copies(q0 + tq, 1 - slot)
            kn.start(); vn.start()

        cur_start = win_start(q0)

    k_view = kbuf.at[slot]                    # (win, D) ref views, no load yet
    v_view = vbuf.at[slot]

    # Band mask |i - j| <= n_neighbor over the (tq, win) score tile, built
    # from global row/col indices (handles sequence-boundary clamping).
    rows = q0 + lax.broadcasted_iota(jnp.int32, (tq, win), 0)
    cols = cur_start + lax.broadcasted_iota(jnp.int32, (tq, win), 1)
    band = jnp.abs(rows - cols) <= n_neighbor

    for h in range(nhead):
        hsl = slice(h * d_k, (h + 1) * d_k)
        qh = q_ref[0, :, hsl]                 # (tq, d_k); already * 1/sqrt(d_k)
        kh = k_view[:, hsl]                   # (win, d_k)
        vh = v_view[:, hsl]                   # (win, d_k)

        # Q K^T contracting the last dims (no K transpose through the XLU).
        s = lax.dot_general(qh, kh,
                            dimension_numbers=(((1,), (1,)), ((), ())),
                            preferred_element_type=jnp.float32)
        s = jnp.where(band, s, _NEG_INF)

        m = jnp.max(s, axis=-1, keepdims=True)
        p = jnp.exp(s - m)
        p = p * pl.reciprocal(jnp.sum(p, axis=-1, keepdims=True), approx=True)
        # TODO(synk): attention-weight dropout left as identity (eval-mode
        # semantics); training would need pltpu.prng_seed + prng_random_bits.

        # Per-head write into the scratch slab bounds live ranges to one head.
        oacc[:, hsl] = jnp.dot(p.astype(vh.dtype), vh,
                               preferred_element_type=jnp.float32)

    # Single lane-dense store; this is already the torch
    # "attn.transpose(1,2).view(B, S, D)" concat-heads layout.
    o_ref[0] = oacc[...].astype(o_ref.dtype)


# ---------------------------------------------------------------------------
# Full MaskAttention forward
# ---------------------------------------------------------------------------
def mask_attention(q, k, v, params, *, nhead, n_neighbor, q_block_target=256):
    B, S, D = q.shape
    assert D % nhead == 0, "d_model must be divisible by nhead"
    d_k = D // nhead
    vmem_limit = _vmem_limit_bytes()

    # Fold 1/sqrt(d_k) into the Q projection (free at runtime; removes the
    # per-head VPU scale inside the attention kernel).
    scale = 1.0 / math.sqrt(d_k)
    wq = params["wq"] * scale
    bq = params["bq"] * scale

    def proj(x, w, bb):
        return linear(x.reshape(B * S, D), w, bb).reshape(B, S, D)

    if (q is k) and (k is v):
        # Self-attention: fuse the three projections -> activation read once.
        w_qkv = jnp.concatenate([wq, params["wk"], params["wv"]], axis=1)
        b_qkv = jnp.concatenate([bq, params["bk"], params["bv"]])
        qkv = linear(q.reshape(B * S, D), w_qkv, b_qkv).reshape(B, S, 3 * D)
        Q, K, V = qkv[..., :D], qkv[..., D:2 * D], qkv[..., 2 * D:]
    else:
        Q = proj(q, wq, bq)
        K = proj(k, params["wk"], params["bk"])
        V = proj(v, params["wv"], params["bv"])

    # Query tile (divisor of S, sublane-aligned) and the lane-aligned banded
    # KV window guaranteed to cover |i-j| <= n_neighbor for every tile row.
    tq = _pick_tile(S, q_block_target, 8)
    num_q = S // tq
    pad = _round_up(n_neighbor, 8)
    win = _round_up(tq + 2 * pad, 128)
    full_window = (win >= S) or (S % 8 != 0) or (tq % 8 != 0)
    if full_window:
        win = S
    nbuf = 1 if full_window else 2

    itemsize = Q.dtype.itemsize
    kv_fetches = B * (1 if full_window else num_q)   # windows actually DMA'd
    cost = pl.CostEstimate(
        flops=4 * B * S * win * D,                   # QK^T + PV over the band
        transcendentals=B * S * win * nhead,         # exp
        bytes_accessed=itemsize * (2 * B * S * D + 2 * kv_fetches * win * D),
    )

    kernel = functools.partial(
        _attn_kernel, nhead=nhead, d_k=d_k, n_neighbor=n_neighbor,
        seq_len=S, tq=tq, win=win, num_q=num_q, pad=pad,
        full_window=full_window)

    attn = pl.pallas_call(
        kernel,
        out_shape=jax.ShapeDtypeStruct((B, S, D), Q.dtype),
        grid=(B, num_q),
        in_specs=[
            pl.BlockSpec((1, tq, D), lambda b, i: (b, i, 0)),
            pl.BlockSpec(memory_space=pl.ANY),        # K stays in HBM
            pl.BlockSpec(memory_space=pl.ANY),        # V stays in HBM
        ],
        out_specs=pl.BlockSpec((1, tq, D), lambda b, i: (b, i, 0)),
        scratch_shapes=[
            pltpu.VMEM((nbuf, win, D), K.dtype),      # K window (double) buffer
            pltpu.VMEM((nbuf, win, D), V.dtype),      # V window (double) buffer
            pltpu.SemaphoreType.DMA((2, nbuf)),       # [k/v, slot]
            pltpu.VMEM((tq, D), jnp.float32),         # concat-heads output slab
        ],
        compiler_params=pltpu.CompilerParams(
            # batch axis megacore-parallel (each batch primes its own DMA
            # pipeline at qi == 0); q axis carries scratch state -> arbitrary.
            dimension_semantics=("parallel", "arbitrary"),
            vmem_limit_bytes=vmem_limit,
        ),
        cost_estimate=cost,
    )(Q, K, V)

    out = linear(attn.reshape(B * S, D), params["wo"], params["bo"])
    return out.reshape(B, S, D)


# ---------------------------------------------------------------------------
# Deterministic parameter init (mimics nn.Linear default uniform init)
# ---------------------------------------------------------------------------
def init_params(key, d_model):
    bound = 1.0 / math.sqrt(d_model)
    names = ["wq", "bq", "wk", "bk", "wv", "bv", "wo", "bo"]
    keys = jax.random.split(key, len(names))
    params = {}
    for n, kk in zip(names, keys):
        if n.startswith("w"):
            # stored as [Din, Dout] so the kernels compute x @ W + b
            params[n] = jax.random.uniform(
                kk, (d_model, d_model), jnp.float32, -bound, bound)
        else:
            params[n] = jax.random.uniform(
                kk, (d_model,), jnp.float32, -bound, bound)
    return params


# ---------------------------------------------------------------------------
# Pure-JAX reference (mirrors the PyTorch module, eval-mode dropout)
# ---------------------------------------------------------------------------
def _reference(q, k, v, params, nhead, n_neighbor):
    B, S, D = q.shape
    d_k = D // nhead

    def lin(x, w, b):
        return x @ w + b

    def split(x):
        return x.reshape(B, S, nhead, d_k).transpose(0, 2, 1, 3)

    Q = split(lin(q, params["wq"], params["bq"]))
    K = split(lin(k, params["wk"], params["bk"]))
    V = split(lin(v, params["wv"], params["bv"]))
    s = jnp.einsum("bhqd,bhkd->bhqk", Q, K) / math.sqrt(d_k)
    idx = jnp.arange(S)
    mask = jnp.abs(idx[:, None] - idx[None, :]) <= n_neighbor
    s = jnp.where(mask[None, None], s, -jnp.inf)
    p = jax.nn.softmax(s, axis=-1)
    a = jnp.einsum("bhqk,bhkd->bhqd", p, V)
    a = a.transpose(0, 2, 1, 3).reshape(B, S, D)
    return lin(a, params["wo"], params["bo"])


if __name__ == "__main__":
    B, D = 2, 32
    S = 512              # exercises the banded-window DMA path
                         # (tq = 256, win = 384 < S)
    nhead = 4
    n_neighbor = 2
    # dropout is identity in this forward (eval-mode semantics)

    root = jax.random.PRNGKey(0)
    kp, kq, kk, kv = jax.random.split(root, 4)
    params = init_params(kp, D)

    q = jax.random.normal(kq, (B, S, D), jnp.float32)
    k = jax.random.normal(kk, (B, S, D), jnp.float32)
    v = jax.random.normal(kv, (B, S, D), jnp.float32)

    out = mask_attention(q, k, v, params, nhead=nhead, n_neighbor=n_neighbor)
    jax.block_until_ready(out)
    assert out.shape == (B, S, D)

    ref = _reference(q, k, v, params, nhead, n_neighbor)
    err = float(jnp.max(jnp.abs(out - ref)))
    assert err < 2e-2, f"max abs error vs reference: {err}"
    print("KERNEL_OK")
</pallas_src>

<mosaic_0001>
module attributes {stable_mosaic.version = 11 : i64} {
  func.func @_linear_kernel(%arg0: i32, %arg1: i32, %arg2: i32, %arg3: memref<512x32xf32, #tpu.memory_space<vmem>>, %arg4: memref<32x32xf32, #tpu.memory_space<vmem>>, %arg5: memref<1x32xf32, #tpu.memory_space<vmem>>, %arg6: memref<512x32xf32, #tpu.memory_space<vmem>>, %arg7: memref<512x32xf32, #tpu.memory_space<vmem>>) attributes {dimension_semantics = [#tpu.dimension_semantics<parallel>, #tpu.dimension_semantics<parallel>, #tpu.dimension_semantics<arbitrary>], iteration_bounds = array<i64: 2, 1, 1>, scalar_prefetch = 0 : i64, scratch_operands = 1 : i64, tpu.core_type = #tpu.core_type<tc>, window_params = [{transform_indices = @transform_0, window_bounds = array<i64: 512, 32>}, {transform_indices = @transform_1, window_bounds = array<i64: 32, 32>}, {transform_indices = @transform_2, window_bounds = array<i64: 1, 32>}, {transform_indices = @transform_3, window_bounds = array<i64: 512, 32>}]} {
    %c0_i32 = arith.constant 0 : i32
    %0 = arith.cmpi eq, %arg2, %c0_i32 : i32
    %1 = arith.extui %0 : i1 to i32
    %c0_i32_0 = arith.constant 0 : i32
    %2 = arith.cmpi ne, %1, %c0_i32_0 : i32
    scf.if %2 {
      %cst_10 = arith.constant 0.000000e+00 : f32
      %12 = vector.broadcast %cst_10 : f32 to vector<512x32xf32>
      %c0_11 = arith.constant 0 : index
      %c0_12 = arith.constant 0 : index
      %13 = vector.load %arg7[%c0_11, %c0_12] : memref<512x32xf32, #tpu.memory_space<vmem>>, vector<512x32xf32>
      tpu.vector_store %arg7[%c0_11, %c0_12], %12 {strides = array<i32>} : memref<512x32xf32, #tpu.memory_space<vmem>>, vector<512x32xf32>,
    } else {
    }
    %c0 = arith.constant 0 : index
    %c0_1 = arith.constant 0 : index
    %3 = vector.load %arg7[%c0, %c0_1] : memref<512x32xf32, #tpu.memory_space<vmem>>, vector<512x32xf32>
    %c0_2 = arith.constant 0 : index
    %c0_3 = arith.constant 0 : index
    %4 = vector.load %arg3[%c0_2, %c0_3] : memref<512x32xf32, #tpu.memory_space<vmem>>, vector<512x32xf32>
    %c0_4 = arith.constant 0 : index
    %c0_5 = arith.constant 0 : index
    %5 = vector.load %arg4[%c0_4, %c0_5] : memref<32x32xf32, #tpu.memory_space<vmem>>, vector<32x32xf32>
    %cst = arith.constant dense<0.000000e+00> : vector<512x32xf32>
    %6 = tpu.matmul %4, %5, %cst {dimension_numbers = #tpu.dot_dimension_numbers<[1], [0], [0], [1], [0, 0, 1, 1], [], []>} : vector<512x32xf32>, vector<32x32xf32>, vector<512x32xf32> -> vector<512x32xf32>
    %7 = arith.addf %3, %6 : vector<512x32xf32>
    %c0_6 = arith.constant 0 : index
    %c0_7 = arith.constant 0 : index
    %8 = vector.load %arg7[%c0_6, %c0_7] : memref<512x32xf32, #tpu.memory_space<vmem>>, vector<512x32xf32>
    tpu.vector_store %arg7[%c0_6, %c0_7], %7 {strides = array<i32>} : memref<512x32xf32, #tpu.memory_space<vmem>>, vector<512x32xf32>,
    %c0_i32_8 = arith.constant 0 : i32
    %9 = arith.cmpi eq, %arg2, %c0_i32_8 : i32
    %10 = arith.extui %9 : i1 to i32
    %c0_i32_9 = arith.constant 0 : i32
    %11 = arith.cmpi ne, %10, %c0_i32_9 : i32
    scf.if %11 {
      %c0_10 = arith.constant 0 : index
      %c0_11 = arith.constant 0 : index
      %12 = vector.load %arg7[%c0_10, %c0_11] : memref<512x32xf32, #tpu.memory_space<vmem>>, vector<512x32xf32>
      %c0_12 = arith.constant 0 : index
      %c0_13 = arith.constant 0 : index
      %13 = vector.load %arg5[%c0_12, %c0_13] : memref<1x32xf32, #tpu.memory_space<vmem>>, vector<1x32xf32>
      %14 = vector.broadcast %13 : vector<1x32xf32> to vector<512x32xf32>
      %15 = arith.addf %12, %14 : vector<512x32xf32>
      %c0_14 = arith.constant 0 : index
      %c0_15 = arith.constant 0 : index
      %16 = vector.load %arg6[%c0_14, %c0_15] : memref<512x32xf32, #tpu.memory_space<vmem>>, vector<512x32xf32>
      tpu.vector_store %arg6[%c0_14, %c0_15], %15 {strides = array<i32>} : memref<512x32xf32, #tpu.memory_space<vmem>>, vector<512x32xf32>,
    } else {
    }
    return
  }
  func.func @transform_0(%arg0: i32, %arg1: i32, %arg2: i32) -> (i32, i32) {
    %c0_i32 = arith.constant 0 : i32
    return %arg0, %arg2 : i32, i32
  }
  func.func @transform_1(%arg0: i32, %arg1: i32, %arg2: i32) -> (i32, i32) {
    %c0_i32 = arith.constant 0 : i32
    return %arg2, %arg1 : i32, i32
  }
  func.func @transform_2(%arg0: i32, %arg1: i32, %arg2: i32) -> (i32, i32) {
    %c0_i32 = arith.constant 0 : i32
    %c0_i32_0 = arith.constant 0 : i32
    return %c0_i32, %arg1 : i32, i32
  }
  func.func @transform_3(%arg0: i32, %arg1: i32, %arg2: i32) -> (i32, i32) {
    %c0_i32 = arith.constant 0 : i32
    return %arg0, %arg1 : i32, i32
  }
}

</mosaic_0001>

<bundles_post_ra>
// kernel: tpu_custom_call.1
= control target key start
LH: loop header
LB: loop body
LE: loop exit
PB: predicated region body
PF: predicated region fallthrough
CT: control target
= control target key end

     0   :  { %8 = vsyncpa [#allocation4], 0  ;;  %s2844_s0 = inlined_call_operand.hbm [shape: f32[1024,32], index: 0, kind: input, shape index: {}]   ;;  %s2845_s1 = inlined_call_operand.hbm [shape: f32[32,32], index: 1, kind: input, shape index: {}]   ;;  %s2846_s2 = inlined_call_operand.hbm [shape: f32[1,32], index: 2, kind: input, shape index: {}]   ;;  %s2847_s3 = inlined_call_operand.hbm [shape: f32[1024,32], index: 3, kind: output, shape index: {}]  }
   0x1   :  { %10 = vsyncpa [#allocation4 + $0x1], 0 }
   0x2   :  { %11 = vsyncpa [#allocation7], 0 }
   0x3   :  { %12 = vsyncpa [#allocation5], 0 }
   0x4   :  { %14 = vsyncpa [#allocation5 + $0x1], 0  ;;  %s2059_s12 = smov 0   ;;  %s2061_s13 = smov 0  }
   0x5   :  { %s2063_s14 = smov 0   ;;  %s2065_s15 = smov 0  }
   0x6   :  { %s2067_s16 = smov 0   ;;  %s2069_s17 = smov 0  }
   0x7 LB: > { %s1498_s18 = sadd.s32 4294967295, %s2028_s17   ;;  %s1499_s19 = sadd.s32 4294967294, %s2028_s17   ;;  %s2028_s17 = sphi %s2069_s17, %s20_s17   ;;  %s2024_s16 = sphi %s2067_s16, %s2869_s16   ;;  %s2020_s15 = sphi %s2065_s15, %s2868_s15   ;;  %s2016_s14 = sphi %s2063_s14, %s2867_s14   ;;  %s2012_s13 = sphi %s2061_s13, %s2866_s13   ;;  %s2008_s12 = sphi %s2059_s12, %s2865_s12  }
   0x8   : > { %p61_p0 = scmp.ne.s32.totalorder %s2012_s13, %s2008_s12  ;;  %p2093_p1 = scmp.eq.s32.totalorder %s1498_s18, 0 }
   0x9   : > { %p2097_p2 = scmp.eq.s32.totalorder %s1498_s18, 1  ;;  %p147_p3 = scmp.eq.s32.totalorder %s1499_s19, 1 }
   0xa   : > { %s2852_s20 = scalar_select %p2093_p1, 1, 0 }
   0xb   : > { %p2103_p4 = por %p2093_p1, %p61_p0  ;;  %p1500_p5 = scmp.ge.s32.totalorder %s2028_s17, 1 }
   0xc   : > { %p2108_p6 = por %p147_p3, %p61_p0  ;;  %p154_p7 = scmp.lt.s32.totalorder %s2028_s17, 3 }
   0xd   : > { %s2854_s22 = scalar_select %p2103_p4, 1, 0 }
   0xe   : > { %s2855_s23 = scalar_select %p2108_p6, 1, 0 }
   0xf   : > { %p2113_p8 = pnand %p1500_p5, %p154_p7  ;;  %s2030_s25 = smov [#allocation6]  }
  0x10   : > { %s170_s26 = sshll.u32 %s2030_s25, 4  ;;  %s2031_s28 = smov [#allocation8]   ;;  %s2117_s26 = int_to_ptr.vmem [resolvable:$true] %s170_s26 }
  0x11   : > { %p1780_p9 = pneg %p2113_p8  ;;  %s186_s29 = sshll.u32 %s2031_s28, 4  ;;  %s2128_s29 = int_to_ptr.vmem [resolvable:$true] %s186_s29 }
  0x12   : > { %s1856_s5 = scalar_lea.hbm %s2845_s1, 512 }
  0x13   : > { %p2124_p11 = pnand %p1780_p9, %p2093_p1  ;;  %p1857_p12 = scmp.ne.s32.totalorder %s2845_s1, %s1856_s5 }
  0x14   : > { %p1863_p5 = scmp.lt.u32.totalorder %s1856_s5, %s2845_s1 }
  0x15   : > { %p1858_p13 = pneg %p2124_p11 }
  0x17   : > { %p1859_p0 = pnand %p1858_p13, %p1857_p12 }
  0x19   : > { %p1860_p3 = pneg %p1859_p0 }
  0x1b   : > { %p1865_p7 = pnand %p1863_p5, %p1860_p3 }
  0x1d   : > { %1868 = shalt.err (!%p1865_p7)
}
  0x1e   : > { %s1869_s10 = scalar_lea.vmem %s2117_s26, 512  ;;  %p1877_p1 = scmp.lt.s32.totalorder %s2117_s26, %s2117_s26 }
  0x1f   : > { %p1870_p9 = scmp.ne.s32.totalorder %s2117_s26, %s1869_s10  ;;  %p1878_p12 = scmp.lt.s32.totalorder %s1869_s10, %s1869_s10 }
  0x21   : > { %p1872_p10 = pnand %p1870_p9, %p1858_p13  ;;  %p1879_p0 = por %p1878_p12, %p1877_p1 }
  0x23   : > { %p1873_p6 = pneg %p1872_p10 }
  0x25   : > { %p1880_p4 = pnand %p1879_p0, %p1873_p6 }
  0x27   : > { %1883 = shalt.err (!%p1880_p4)
}
  0x28   : > { %s2032_s11 = smov 128   ;;  %s2033_s18 = smov 8  }
  0x29   : > { %1783 = dma.hbm_to_vmem [thread:$0]  (!%p2124_p11), %s2845_s1, 512, %s2117_s26, [#allocation7], %s2032_s11, %s2032_s11, %s2033_s18  }
  0x2a   : > { %s1884_s4 = scalar_lea.hbm %s2846_s2, 16 }
  0x2b   : > { %p1885_p1 = scmp.ne.s32.totalorder %s2846_s2, %s1884_s4  ;;  %p1891_p10 = scmp.lt.u32.totalorder %s1884_s4, %s2846_s2 }
  0x2d   : > { %p1887_p4 = pnand %p1885_p1, %p1858_p13 }
  0x2f   : > { %p1888_p6 = pneg %p1887_p4 }
  0x31   : > { %p1893_p3 = pnand %p1891_p10, %p1888_p6 }
  0x33   : > { %1896 = shalt.err (!%p1893_p3)
}
  0x34   : > { %s1897_s26 = scalar_lea.vmem %s2128_s29, 16  ;;  %s1904_s9 = scalar_lea.vmem %s2128_s29, 32 }
  0x35   : > { %p1898_p5 = scmp.ne.s32.totalorder %s2128_s29, %s1897_s26  ;;  %p1905_p12 = scmp.lt.s32.totalorder %s2128_s29, %s2128_s29 }
  0x36   : > { %p1906_p0 = scmp.lt.s32.totalorder %s1904_s9, %s1897_s26 }
  0x37   : > { %p1900_p7 = pnand %p1898_p5, %p1858_p13 }
  0x38   : > { %p1907_p1 = por %p1906_p0, %p1905_p12 }
  0x39   : > { %p1901_p9 = pneg %p1900_p7 }
  0x3b   : > { %p1908_p4 = pnand %p1907_p1, %p1901_p9 }
  0x3d   : > { %1911 = shalt.err (!%p1908_p4)
}
  0x3e   : > { %1786 = dma.hbm_to_vmem [thread:$0]  (!%p2124_p11), %s2846_s2, 16, %s2128_s29, [#allocation7]  }
  0x3f   : > { %s39_s25 = sadd.s32 1, %s2024_s16  ;;  %s48_s28 = sadd.s32 1, %s2016_s14 }
  0x40   : > { %p41_p13 = scmp.ge.s32.totalorder %s39_s25, 2  ;;  %p55_p6 = scmp.ne.s32.totalorder %s2016_s14, %s2012_s13 }
  0x41   : > { %p56_p10 = scmp.eq.s32.totalorder %s2028_s17, 0  ;;  %p1797_p3 = scmp.lt.s32.totalorder %s2028_s17, 2 }
  0x42   : > { %s2871_s25 = smov (%p41_p13, %s39_s25), 0  ;;  %p2196_p7 = por %p2097_p2, %p55_p6 }
  0x43   : > { %p57_p5 = por %p56_p10, %p55_p6  ;;  %s43_s30 = ssub.s32 %s2024_s16, %s2871_s25 }
  0x44   : > { %s2858_s27 = scalar_select %p2196_p7, 1, 0 }
  0x45   : > { %s197_s4 = sand.u32 1, %s2016_s14   ;;  %p46_p9 = scmp.eq.s32.totalorder %s43_s30, 0 }
  0x46   : > { %s1504_s29 = sshll.u32 %s197_s4, 9  ;;  %s1582_s5 = sshll.u32 %s2024_s16, 13 }
  0x47   : > { %s2205_s6 = scalar_select %p46_p9, %s2016_s14, %s48_s28  }
  0x48   : > { %s2210_s26 = scalar_lea.hbm %s2844_s0, %s1582_s5  ;;  %s201_s21 = scalar_lea.vmem [#allocation3], %s1504_s29 }
  0x49   : > { %s209_s9 = sshll.u32 %s201_s21, 4  ;;  %p2214_p2 = pnand %p1797_p3, %p57_p5  ;;  %s2218_s9 = int_to_ptr.vmem [resolvable:$true] %s209_s9 }
  0x4a   : > { %s2220_s19 = scalar_lea.sflag [#allocation4], %s197_s4  ;;  %s1912_s28 = scalar_lea.hbm %s2210_s26, 8192 }
  0x4b   : > { %p1913_p11 = scmp.ne.s32.totalorder %s2210_s26, %s1912_s28  ;;  %p1914_p12 = pneg %p2214_p2 }
  0x4c   : > { %s1917_s5 = scalar_lea.hbm %s2844_s0, 16384  ;;  %p1918_p4 = scmp.lt.u32.totalorder %s2210_s26, %s2844_s0 }
  0x4d   : > { %p1915_p0 = pnand %p1914_p12, %p1913_p11  ;;  %p1919_p13 = scmp.lt.u32.totalorder %s1917_s5, %s1912_s28 }
  0x4e   : > { %p1921_p10 = scmp.lt.u32.totalorder %s1912_s28, %s2210_s26 }
  0x4f   : > { %p1916_p1 = pneg %p1915_p0  ;;  %p1920_p6 = por %p1919_p13, %p1918_p4 }
  0x51   : > { %p1922_p3 = por %p1921_p10, %p1920_p6 }
  0x53   : > { %p1923_p5 = pnand %p1922_p3, %p1916_p1 }
  0x55   : > { %1926 = shalt.err (!%p1923_p5)
}
  0x56   : > { %s1927_s4 = scalar_lea.vmem %s2218_s9, 8192  ;;  %s2034_s21 = smov [#allocation3]  }
  0x57   : > { %p1928_p9 = scmp.ne.s32.totalorder %s2218_s9, %s1927_s4  ;;  %s1932_s30 = sshll.u32 %s2034_s21, 4  ;;  %s1933_s30 = int_to_ptr.vmem [resolvable:$false] %s1932_s30 }
  0x58   : > { %s1934_s29 = scalar_lea.vmem %s1933_s30, 16384  ;;  %p1935_p7 = scmp.lt.s32.totalorder %s2218_s9, %s1933_s30 }
  0x59   : > { %p1930_p11 = pnand %p1928_p9, %p1914_p12  ;;  %p1936_p4 = scmp.lt.s32.totalorder %s1934_s29, %s1927_s4 }
  0x5b   : > { %p1931_p0 = pneg %p1930_p11  ;;  %p1937_p13 = por %p1936_p4, %p1935_p7 }
  0x5d   : > { %p1938_p6 = pnand %p1937_p13, %p1931_p0 }
  0x5f   : > { %1941 = shalt.err (!%p1938_p6)
}
  0x60   : > { %1790 = dma.hbm_to_vmem [thread:$0]  (!%p2214_p2), %s2210_s26, 8192, %s2218_s9, %s2220_s19, %s2032_s11, %s2032_s11, %s2033_s18  }
  0x61   : > { %221 = sbr.rel (%p2113_p8) target bundleno = 421 (0x1a5), region = 32  ;;  %s2254_s28 = sand.u32 (!%p2113_p8), 1, %s2012_s13  }
  0x62   : > { %s1508_s5 = sshll.u32 (!%p2113_p8), %s2254_s28, 9  ;;  %s224_s7 = scalar_lea.sflag (!%p2113_p8), [#allocation4], %s2254_s28 }
  0x63   : > { %s2260_s10 = scalar_lea.vmem (!%p2113_p8), [#allocation3], %s1508_s5  ;;  %p2860_p7 = scmp.ne.s32.totalorder (!%p2113_p8), %s2854_s22, 0 }
  0x68   : > { %1995 = dma.done.wait (%p2860_p7), %s224_s7, 8192  }
  0x69   : > { %1997 = vsyncadd (%p2860_p7), %s224_s7, 4294959104  ;;  %p2861_p2 = scmp.ne.s32.totalorder %s2852_s20, 0 }
  0x6b   : > { %1999 = dma.done.wait (%p2861_p2), [#allocation7], 528  }
  0x6c   : > { %2001 = vsyncadd (%p2861_p2), [#allocation7], 4294966768  ;;  %vm265_vm0 = vcmask 261120   ;;  %v2035_v0 = vmov 0.0   ;;  %v458_v1 = vld [vmem:[#allocation6] sm:$0xff]  ;;  %v459_v2 = vld [vmem:[#allocation6 + $0x8] sm:$0xff] }
  0x6d   : > { %267 = vst.msk [vmem:[#allocation2 + $0x8] sm:$0xff] %vm265_vm0, %v2035_v0  ;;  %266 = vst.msk [vmem:[#allocation2] sm:$0xff] %vm265_vm0, %v2035_v0  ;;  %v460_v3 = vld [vmem:[#allocation6 + $0x10] sm:$0xff]  ;;  %v1756_v4 = vpack.c.bf16 %v459_v2, %v458_v1  ;;  %v461_v5 = vld [vmem:[#allocation6 + $0x18] sm:$0xff]  ;;  %s2546_s20 = scalar_lea.vmem [#allocation9], %s1508_s5  ;;  %s1583_s22 = sshll.u32 %s2020_s15, 13 }
  0x6e   : > { %268 = vst.msk [vmem:[#allocation2 + $0x10] sm:$0xff] %vm265_vm0, %v2035_v0  ;;  %269 = vst.msk [vmem:[#allocation2 + $0x18] sm:$0xff] %vm265_vm0, %v2035_v0  ;;  %v394_v6 = vld [vmem:[%s2260_s10] sm:$0xff]  ;;  %v1760_v8 = vpack.c.bf16 %v461_v5, %v460_v3  ;;  %v395_v9 = vld [vmem:[%s2260_s10 + $0x8] sm:$0xff]  ;;  %s1385_s24 = sshll.u32 %s2546_s20, 4  ;;  %s2783_s18 = scalar_lea.hbm %s2847_s3, %s1583_s22  ;;  %s2785_s24 = int_to_ptr.vmem [resolvable:$true] %s1385_s24 }
  0x6f   : > { %270 = vst.msk [vmem:[#allocation2 + $0x20] sm:$0xff] %vm265_vm0, %v2035_v0  ;;  %271 = vst.msk [vmem:[#allocation2 + $0x28] sm:$0xff] %vm265_vm0, %v2035_v0  ;;  %v426_v7 = vld [vmem:[%s2260_s10 + $0x100] sm:$0xff]  ;;  %1660 = vmatprep.mubr.msk.f32.mxu0 %vm265_vm0, %v394_v6  ;;  %1757 = vmatprep.subr.bf16.mxu0 %v1756_v4  ;;  %v427_v10 = vld [vmem:[%s2260_s10 + $0x108] sm:$0xff]  ;;  %s1371_s26 = scalar_lea.sflag [#allocation5], %s2254_s28  ;;  %s1942_s9 = scalar_lea.vmem %s2785_s24, 8192 }
  0x70   : > { %272 = vst.msk [vmem:[#allocation2 + $0x30] sm:$0xff] %vm265_vm0, %v2035_v0  ;;  %273 = vst.msk [vmem:[#allocation2 + $0x38] sm:$0xff] %vm265_vm0, %v2035_v0  ;;  %1708 = vmatprep.mubr.msk.f32.mxu1 %vm265_vm0, %v426_v7  ;;  %1764 = vmatprep.subr.bf16.mxu1 %v1756_v4  ;;  %v396_v11 = vld [vmem:[%s2260_s10 + $0x10] sm:$0xff]  ;;  %v397_v13 = vld [vmem:[%s2260_s10 + $0x18] sm:$0xff]  ;;  %p1943_p8 = scmp.ne.s32.totalorder %s2785_s24, %s1942_s9  ;;  %p2862_p12 = scmp.ne.s32.totalorder %s2858_s27, 0 }
  0x71   : > { %274 = vst.msk [vmem:[#allocation2 + $0x40] sm:$0xff] %vm265_vm0, %v2035_v0  ;;  %275 = vst.msk [vmem:[#allocation2 + $0x48] sm:$0xff] %vm265_vm0, %v2035_v0  ;;  %1759 = vmatpush3.bf16.msra.mxu0 %v1756_v4  ;;  %1766 = vmatpush3.bf16.msra.mxu1 %v1756_v4  ;;  %v428_v12 = vld [vmem:[%s2260_s10 + $0x110] sm:$0xff]  ;;  %v429_v14 = vld [vmem:[%s2260_s10 + $0x118] sm:$0xff]  ;;  %s2036_s19 = smov [#allocation9]  }
  0x72   : > { %276 = vst.msk [vmem:[#allocation2 + $0x50] sm:$0xff] %vm265_vm0, %v2035_v0  ;;  %277 = vst.msk [vmem:[#allocation2 + $0x58] sm:$0xff] %vm265_vm0, %v2035_v0  ;;  %1761 = vmatprep.subr.bf16.mxu0 %v1760_v8  ;;  %1765 = vmatprep.subr.bf16.mxu1 %v1760_v8  ;;  %v398_v15 = vld [vmem:[%s2260_s10 + $0x20] sm:$0xff]  ;;  %v399_v17 = vld [vmem:[%s2260_s10 + $0x28] sm:$0xff]  ;;  %p1944_p1 = pnand %p1943_p8, %p2862_p12  ;;  %s1946_s8 = sshll.u32 %s2036_s19, 4  ;;  %s1947_s8 = int_to_ptr.vmem [resolvable:$false] %s1946_s8 }
  0x73   : > { %278 = vst.msk [vmem:[#allocation2 + $0x60] sm:$0xff] %vm265_vm0, %v2035_v0  ;;  %279 = vst.msk [vmem:[#allocation2 + $0x68] sm:$0xff] %vm265_vm0, %v2035_v0  ;;  %v430_v16 = vld [vmem:[%s2260_s10 + $0x120] sm:$0xff]  ;;  %v431_v18 = vld [vmem:[%s2260_s10 + $0x128] sm:$0xff]  ;;  %s1948_s4 = scalar_lea.vmem %s1947_s8, 16384  ;;  %p1949_p3 = scmp.lt.s32.totalorder %s2785_s24, %s1947_s8 }
  0x74   : > { %280 = vst.msk [vmem:[#allocation2 + $0x70] sm:$0xff] %vm265_vm0, %v2035_v0  ;;  %281 = vst.msk [vmem:[#allocation2 + $0x78] sm:$0xff] %vm265_vm0, %v2035_v0  ;;  %v400_v19 = vld [vmem:[%s2260_s10 + $0x30] sm:$0xff]  ;;  %v401_v21 = vld [vmem:[%s2260_s10 + $0x38] sm:$0xff]  ;;  %p1945_p10 = pneg %p1944_p1  ;;  %p1950_p5 = scmp.lt.s32.totalorder %s1948_s4, %s1942_s9 }
  0x75   : > { %282 = vst.msk [vmem:[#allocation2 + $0x80] sm:$0xff] %vm265_vm0, %v2035_v0  ;;  %283 = vst.msk [vmem:[#allocation2 + $0x88] sm:$0xff] %vm265_vm0, %v2035_v0  ;;  %1763 = vmatpush3.bf16.msra.mxu0 %v1760_v8  ;;  %1767 = vmatpush3.bf16.msra.mxu1 %v1760_v8  ;;  %v432_v20 = vld [vmem:[%s2260_s10 + $0x130] sm:$0xff]  ;;  %v433_v22 = vld [vmem:[%s2260_s10 + $0x138] sm:$0xff] }
  0x76   : > { %284 = vst.msk [vmem:[#allocation2 + $0x90] sm:$0xff] %vm265_vm0, %v2035_v0  ;;  %285 = vst.msk [vmem:[#allocation2 + $0x98] sm:$0xff] %vm265_vm0, %v2035_v0  ;;  %v402_v23 = vld [vmem:[%s2260_s10 + $0x40] sm:$0xff]  ;;  %v403_v25 = vld [vmem:[%s2260_s10 + $0x48] sm:$0xff]  ;;  %p1951_p9 = por %p1950_p5, %p1949_p3 }
  0x77   : > { %286 = vst.msk [vmem:[#allocation2 + $0xa0] sm:$0xff] %vm265_vm0, %v2035_v0  ;;  %287 = vst.msk [vmem:[#allocation2 + $0xa8] sm:$0xff] %vm265_vm0, %v2035_v0  ;;  %v434_v24 = vld [vmem:[%s2260_s10 + $0x140] sm:$0xff]  ;;  %v435_v26 = vld [vmem:[%s2260_s10 + $0x148] sm:$0xff] }
  0x78   : > { %288 = vst.msk [vmem:[#allocation2 + $0xb0] sm:$0xff] %vm265_vm0, %v2035_v0  ;;  %289 = vst.msk [vmem:[#allocation2 + $0xb8] sm:$0xff] %vm265_vm0, %v2035_v0  ;;  %1661 = vmatmul.mubr.msk.f32.vlgmr.msra.gmra.mrb[0].mxu0 %vm265_vm0, %v395_v9  ;;  %1709 = vmatmul.mubr.msk.f32.vlgmr.msra.gmra.mrb[0].mxu1 %vm265_vm0, %v427_v10  ;;  %v404_v27 = vld [vmem:[%s2260_s10 + $0x50] sm:$0xff]  ;;  %v405_v29 = vld [vmem:[%s2260_s10 + $0x58] sm:$0xff]  ;;  %p1952_p11 = pnand %p1951_p9, %p1945_p10 }
  0x79   : > { %290 = vst.msk [vmem:[#allocation2 + $0xc0] sm:$0xff] %vm265_vm0, %v2035_v0  ;;  %291 = vst.msk [vmem:[#allocation2 + $0xc8] sm:$0xff] %vm265_vm0, %v2035_v0  ;;  %1663 = vmatprep.mubr.msk.f32.mxu0 %vm265_vm0, %v396_v11  ;;  %1711 = vmatprep.mubr.msk.f32.mxu1 %vm265_vm0, %v428_v12  ;;  %v436_v28 = vld [vmem:[%s2260_s10 + $0x150] sm:$0xff]  ;;  %v437_v30 = vld [vmem:[%s2260_s10 + $0x158] sm:$0xff] }
  0x7a   : > { %292 = vst.msk [vmem:[#allocation2 + $0xd0] sm:$0xff] %vm265_vm0, %v2035_v0  ;;  %293 = vst.msk [vmem:[#allocation2 + $0xd8] sm:$0xff] %vm265_vm0, %v2035_v0  ;;  %v406_v31 = vld [vmem:[%s2260_s10 + $0x60] sm:$0xff]  ;;  %v407_v33 = vld [vmem:[%s2260_s10 + $0x68] sm:$0xff] }
  0x7b   : > { %294 = vst.msk [vmem:[#allocation2 + $0xe0] sm:$0xff] %vm265_vm0, %v2035_v0  ;;  %295 = vst.msk [vmem:[#allocation2 + $0xe8] sm:$0xff] %vm265_vm0, %v2035_v0  ;;  %v438_v32 = vld [vmem:[%s2260_s10 + $0x160] sm:$0xff]  ;;  %v439_v34 = vld [vmem:[%s2260_s10 + $0x168] sm:$0xff] }
  0x7c   : > { %296 = vst.msk [vmem:[#allocation2 + $0xf0] sm:$0xff] %vm265_vm0, %v2035_v0  ;;  %297 = vst.msk [vmem:[#allocation2 + $0xf8] sm:$0xff] %vm265_vm0, %v2035_v0  ;;  %1664 = vmatmul.mubr.msk.f32.gmra.mrb[2].mxu0 %vm265_vm0, %v397_v13  ;;  %1712 = vmatmul.mubr.msk.f32.gmra.mrb[2].mxu1 %vm265_vm0, %v429_v14  ;;  %v408_v35 = vld [vmem:[%s2260_s10 + $0x70] sm:$0xff]  ;;  %v409_v37 = vld [vmem:[%s2260_s10 + $0x78] sm:$0xff] }
  0x7d   : > { %298 = vst.msk [vmem:[#allocation2 + $0x100] sm:$0xff] %vm265_vm0, %v2035_v0  ;;  %299 = vst.msk [vmem:[#allocation2 + $0x108] sm:$0xff] %vm265_vm0, %v2035_v0  ;;  %1666 = vmatprep.mubr.msk.f32.mxu0 %vm265_vm0, %v398_v15  ;;  %1714 = vmatprep.mubr.msk.f32.mxu1 %vm265_vm0, %v430_v16  ;;  %v440_v36 = vld [vmem:[%s2260_s10 + $0x170] sm:$0xff]  ;;  %v441_v38 = vld [vmem:[%s2260_s10 + $0x178] sm:$0xff] }
  0x7e   : > { %300 = vst.msk [vmem:[#allocation2 + $0x110] sm:$0xff] %vm265_vm0, %v2035_v0  ;;  %301 = vst.msk [vmem:[#allocation2 + $0x118] sm:$0xff] %vm265_vm0, %v2035_v0  ;;  %v410_v39 = vld [vmem:[%s2260_s10 + $0x80] sm:$0xff]  ;;  %v411_v41 = vld [vmem:[%s2260_s10 + $0x88] sm:$0xff] }
  0x7f   : > { %302 = vst.msk [vmem:[#allocation2 + $0x120] sm:$0xff] %vm265_vm0, %v2035_v0  ;;  %303 = vst.msk [vmem:[#allocation2 + $0x128] sm:$0xff] %vm265_vm0, %v2035_v0  ;;  %v442_v40 = vld [vmem:[%s2260_s10 + $0x180] sm:$0xff]  ;;  %v443_v42 = vld [vmem:[%s2260_s10 + $0x188] sm:$0xff] }
  0x80   : > { %304 = vst.msk [vmem:[#allocation2 + $0x130] sm:$0xff] %vm265_vm0, %v2035_v0  ;;  %305 = vst.msk [vmem:[#allocation2 + $0x138] sm:$0xff] %vm265_vm0, %v2035_v0  ;;  %1667 = vmatmul.mubr.msk.f32.gmra.mrb[4].mxu0 %vm265_vm0, %v399_v17  ;;  %1715 = vmatmul.mubr.msk.f32.gmra.mrb[4].mxu1 %vm265_vm0, %v431_v18  ;;  %v412_v43 = vld [vmem:[%s2260_s10 + $0x90] sm:$0xff]  ;;  %v413_v45 = vld [vmem:[%s2260_s10 + $0x98] sm:$0xff] }
  0x81   : > { %306 = vst.msk [vmem:[#allocation2 + $0x140] sm:$0xff] %vm265_vm0, %v2035_v0  ;;  %307 = vst.msk [vmem:[#allocation2 + $0x148] sm:$0xff] %vm265_vm0, %v2035_v0  ;;  %1669 = vmatprep.mubr.msk.f32.mxu0 %vm265_vm0, %v400_v19  ;;  %1717 = vmatprep.mubr.msk.f32.mxu1 %vm265_vm0, %v432_v20  ;;  %v444_v44 = vld [vmem:[%s2260_s10 + $0x190] sm:$0xff]  ;;  %v445_v46 = vld [vmem:[%s2260_s10 + $0x198] sm:$0xff] }
  0x82   : > { %308 = vst.msk [vmem:[#allocation2 + $0x150] sm:$0xff] %vm265_vm0, %v2035_v0  ;;  %309 = vst.msk [vmem:[#allocation2 + $0x158] sm:$0xff] %vm265_vm0, %v2035_v0  ;;  %v414_v47 = vld [vmem:[%s2260_s10 + $0xa0] sm:$0xff]  ;;  %v415_v49 = vld [vmem:[%s2260_s10 + $0xa8] sm:$0xff] }
  0x83   : > { %310 = vst.msk [vmem:[#allocation2 + $0x160] sm:$0xff] %vm265_vm0, %v2035_v0  ;;  %311 = vst.msk [vmem:[#allocation2 + $0x168] sm:$0xff] %vm265_vm0, %v2035_v0  ;;  %v446_v48 = vld [vmem:[%s2260_s10 + $0x1a0] sm:$0xff]  ;;  %v447_v50 = vld [vmem:[%s2260_s10 + $0x1a8] sm:$0xff] }
  0x84   : > { %312 = vst.msk [vmem:[#allocation2 + $0x170] sm:$0xff] %vm265_vm0, %v2035_v0  ;;  %313 = vst.msk [vmem:[#allocation2 + $0x178] sm:$0xff] %vm265_vm0, %v2035_v0  ;;  %1670 = vmatmul.mubr.msk.f32.gmra.mrb[6].mxu0 %vm265_vm0, %v401_v21  ;;  %1718 = vmatmul.mubr.msk.f32.gmra.mrb[6].mxu1 %vm265_vm0, %v433_v22  ;;  %v416_v51 = vld [vmem:[%s2260_s10 + $0xb0] sm:$0xff]  ;;  %v417_v53 = vld [vmem:[%s2260_s10 + $0xb8] sm:$0xff] }
  0x85   : > { %314 = vst.msk [vmem:[#allocation2 + $0x180] sm:$0xff] %vm265_vm0, %v2035_v0  ;;  %315 = vst.msk [vmem:[#allocation2 + $0x188] sm:$0xff] %vm265_vm0, %v2035_v0  ;;  %1672 = vmatprep.mubr.msk.f32.mxu0 %vm265_vm0, %v402_v23  ;;  %1720 = vmatprep.mubr.msk.f32.mxu1 %vm265_vm0, %v434_v24  ;;  %v448_v52 = vld [vmem:[%s2260_s10 + $0x1b0] sm:$0xff]  ;;  %v449_v54 = vld [vmem:[%s2260_s10 + $0x1b8] sm:$0xff] }
  0x86   : > { %316 = vst.msk [vmem:[#allocation2 + $0x190] sm:$0xff] %vm265_vm0, %v2035_v0  ;;  %317 = vst.msk [vmem:[#allocation2 + $0x198] sm:$0xff] %vm265_vm0, %v2035_v0  ;;  %v418_v55 = vld [vmem:[%s2260_s10 + $0xc0] sm:$0xff]  ;;  %v419_v57 = vld [vmem:[%s2260_s10 + $0xc8] sm:$0xff] }
  0x87   : > { %318 = vst.msk [vmem:[#allocation2 + $0x1a0] sm:$0xff] %vm265_vm0, %v2035_v0  ;;  %319 = vst.msk [vmem:[#allocation2 + $0x1a8] sm:$0xff] %vm265_vm0, %v2035_v0  ;;  %v450_v56 = vld [vmem:[%s2260_s10 + $0x1c0] sm:$0xff]  ;;  %v451_v58 = vld [vmem:[%s2260_s10 + $0x1c8] sm:$0xff] }
  0x88   : > { %320 = vst.msk [vmem:[#allocation2 + $0x1b0] sm:$0xff] %vm265_vm0, %v2035_v0  ;;  %321 = vst.msk [vmem:[#allocation2 + $0x1b8] sm:$0xff] %vm265_vm0, %v2035_v0  ;;  %1673 = vmatmul.mubr.msk.f32.gmra.mrb[8].mxu0 %vm265_vm0, %v403_v25  ;;  %1721 = vmatmul.mubr.msk.f32.gmra.mrb[8].mxu1 %vm265_vm0, %v435_v26  ;;  %v420_v59 = vld [vmem:[%s2260_s10 + $0xd0] sm:$0xff]  ;;  %v421_v61 = vld [vmem:[%s2260_s10 + $0xd8] sm:$0xff] }
  0x89   : > { %322 = vst.msk [vmem:[#allocation2 + $0x1c0] sm:$0xff] %vm265_vm0, %v2035_v0  ;;  %323 = vst.msk [vmem:[#allocation2 + $0x1c8] sm:$0xff] %vm265_vm0, %v2035_v0  ;;  %1675 = vmatprep.mubr.msk.f32.mxu0 %vm265_vm0, %v404_v27  ;;  %1723 = vmatprep.mubr.msk.f32.mxu1 %vm265_vm0, %v436_v28  ;;  %v452_v60 = vld [vmem:[%s2260_s10 + $0x1d0] sm:$0xff]  ;;  %v453_v62 = vld [vmem:[%s2260_s10 + $0x1d8] sm:$0xff] }
  0x8a   : > { %324 = vst.msk [vmem:[#allocation2 + $0x1d0] sm:$0xff] %vm265_vm0, %v2035_v0  ;;  %325 = vst.msk [vmem:[#allocation2 + $0x1d8] sm:$0xff] %vm265_vm0, %v2035_v0  ;;  %v422_v63 = vld [vmem:[%s2260_s10 + $0xe0] sm:$0xff]  ;;  %v423_v1 = vld [vmem:[%s2260_s10 + $0xe8] sm:$0xff] }
  0x8b   : > { %326 = vst.msk [vmem:[#allocation2 + $0x1e0] sm:$0xff] %vm265_vm0, %v2035_v0  ;;  %327 = vst.msk [vmem:[#allocation2 + $0x1e8] sm:$0xff] %vm265_vm0, %v2035_v0  ;;  %v455_v2 = vld [vmem:[%s2260_s10 + $0x1e8] sm:$0xff]  ;;  %v424_v3 = vld [vmem:[%s2260_s10 + $0xf0] sm:$0xff] }
  0x8c   : > { %328 = vst.msk [vmem:[#allocation2 + $0x1f0] sm:$0xff] %vm265_vm0, %v2035_v0  ;;  %329 = vst.msk [vmem:[#allocation2 + $0x1f8] sm:$0xff] %vm265_vm0, %v2035_v0  ;;  %1676 = vmatmul.mubr.msk.f32.gmra.mrb[10].mxu0 %vm265_vm0, %v405_v29  ;;  %1724 = vmatmul.mubr.msk.f32.gmra.mrb[10].mxu1 %vm265_vm0, %v437_v30  ;;  %v454_v0 = vld [vmem:[%s2260_s10 + $0x1e0] sm:$0xff]  ;;  %v456_v4 = vld [vmem:[%s2260_s10 + $0x1f0] sm:$0xff] }
  0x8d   : > { %1678 = vmatprep.mubr.msk.f32.mxu0 %vm265_vm0, %v406_v31  ;;  %1726 = vmatprep.mubr.msk.f32.mxu1 %vm265_vm0, %v438_v32  ;;  %v425_v5 = vld [vmem:[%s2260_s10 + $0xf8] sm:$0xff]  ;;  %v331_v7 = vld [vmem:[#allocation2 + $0x8] sm:$0xff]  ;;  %v330_v9 = vld [vmem:[#allocation2] sm:$0xff] }
  0x8e   : > { %v457_v6 = vld [vmem:[%s2260_s10 + $0x1f8] sm:$0xff]  ;;  %v363_v8 = vld [vmem:[#allocation2 + $0x108] sm:$0xff]  ;;  %v362_v10 = vld [vmem:[#allocation2 + $0x100] sm:$0xff] }
  0x8f   : > { %v333_v19 = vld [vmem:[#allocation2 + $0x18] sm:$0xff]  ;;  %v332_v21 = vld [vmem:[#allocation2 + $0x10] sm:$0xff]  ;;  %v335_v31 = vld [vmem:[#allocation2 + $0x28] sm:$0xff] }
  0x90   : > { %1679 = vmatmul.mubr.msk.f32.gmra.mrb[12].mxu0 %vm265_vm0, %v407_v33  ;;  %1727 = vmatmul.mubr.msk.f32.gmra.mrb[12].mxu1 %vm265_vm0, %v439_v34  ;;  %v365_v20 = vld [vmem:[#allocation2 + $0x118] sm:$0xff]  ;;  %v364_v22 = vld [vmem:[#allocation2 + $0x110] sm:$0xff]  ;;  %v367_v32 = vld [vmem:[#allocation2 + $0x128] sm:$0xff] }
  0x91   : > { %1681 = vmatprep.mubr.msk.f32.mxu0 %vm265_vm0, %v408_v35  ;;  %1729 = vmatprep.mubr.msk.f32.mxu1 %vm265_vm0, %v440_v36  ;;  %v334_v33 = vld [vmem:[#allocation2 + $0x20] sm:$0xff] }
  0x92   : > { %v366_v34 = vld [vmem:[#allocation2 + $0x120] sm:$0xff] }
  0x93   : > { %v2532_v35 = vld [vmem:[#allocation8] ss:$0 sm:$0xff] }
  0x94   : > { %1682 = vmatmul.mubr.msk.f32.gmra.mrb[14].mxu0 %vm265_vm0, %v409_v37  ;;  %1730 = vmatmul.mubr.msk.f32.gmra.mrb[14].mxu1 %vm265_vm0, %v441_v38 }
  0x95   : > { %1684 = vmatprep.mubr.msk.f32.mxu0 %vm265_vm0, %v410_v39  ;;  %1732 = vmatprep.mubr.msk.f32.mxu1 %vm265_vm0, %v442_v40 }
  0x98   : > { %1685 = vmatmul.mubr.msk.f32.gmra.mrb[16].mxu0 %vm265_vm0, %v411_v41  ;;  %1733 = vmatmul.mubr.msk.f32.gmra.mrb[16].mxu1 %vm265_vm0, %v443_v42  ;;  %v337_v42 = vld [vmem:[#allocation2 + $0x38] sm:$0xff] }
  0x99   : > { %1687 = vmatprep.mubr.msk.f32.mxu0 %vm265_vm0, %v412_v43  ;;  %1735 = vmatprep.mubr.msk.f32.mxu1 %vm265_vm0, %v444_v44  ;;  %v369_v43 = vld [vmem:[#allocation2 + $0x138] sm:$0xff] }
  0x9c   : > { %1688 = vmatmul.mubr.msk.f32.gmra.mrb[18].mxu0 %vm265_vm0, %v413_v45  ;;  %1736 = vmatmul.mubr.msk.f32.gmra.mrb[18].mxu1 %vm265_vm0, %v445_v46 }
  0x9d   : > { %1690 = vmatprep.mubr.msk.f32.mxu0 %vm265_vm0, %v414_v47  ;;  %1738 = vmatprep.mubr.msk.f32.mxu1 %vm265_vm0, %v446_v48  ;;  %v336_v48 = vld [vmem:[#allocation2 + $0x30] sm:$0xff] }
  0xa0   : > { %1691 = vmatmul.mubr.msk.f32.gmra.mrb[20].mxu0 %vm265_vm0, %v415_v49  ;;  %1739 = vmatmul.mubr.msk.f32.gmra.mrb[20].mxu1 %vm265_vm0, %v447_v50 }
  0xa1   : > { %1693 = vmatprep.mubr.msk.f32.mxu0 %vm265_vm0, %v416_v51  ;;  %1741 = vmatprep.mubr.msk.f32.mxu1 %vm265_vm0, %v448_v52 }
  0xa4   : > { %1694 = vmatmul.mubr.msk.f32.gmra.mrb[22].mxu0 %vm265_vm0, %v417_v53  ;;  %1742 = vmatmul.mubr.msk.f32.gmra.mrb[22].mxu1 %vm265_vm0, %v449_v54  ;;  %v368_v53 = vld [vmem:[#allocation2 + $0x130] sm:$0xff] }
  0xa5   : > { %1696 = vmatprep.mubr.msk.f32.mxu0 %vm265_vm0, %v418_v55  ;;  %1744 = vmatprep.mubr.msk.f32.mxu1 %vm265_vm0, %v450_v56 }
  0xa8   : > { %1697 = vmatmul.mubr.msk.f32.gmra.mrb[24].mxu0 %vm265_vm0, %v419_v57  ;;  %1745 = vmatmul.mubr.msk.f32.gmra.mrb[24].mxu1 %vm265_vm0, %v451_v58 }
  0xa9   : > { %1699 = vmatprep.mubr.msk.f32.mxu0 %vm265_vm0, %v420_v59  ;;  %1747 = vmatprep.mubr.msk.f32.mxu1 %vm265_vm0, %v452_v60 }
  0xac   : > { %1700 = vmatmul.mubr.msk.f32.gmra.mrb[26].mxu0 %vm265_vm0, %v421_v61  ;;  %1748 = vmatmul.mubr.msk.f32.gmra.mrb[26].mxu1 %vm265_vm0, %v453_v62  ;;  %v339_v62 = vld [vmem:[#allocation2 + $0x48] sm:$0xff] }
  0xad   : > { %1702 = vmatprep.mubr.msk.f32.mxu0 %vm265_vm0, %v422_v63  ;;  %1750 = vmatprep.mubr.msk.f32.mxu1 %vm265_vm0, %v454_v0  ;;  %v371_v63 = vld [vmem:[#allocation2 + $0x148] sm:$0xff] }
  0xb0   : > { %1703 = vmatmul.mubr.msk.f32.gmra.mrb[28].mxu0 %vm265_vm0, %v423_v1  ;;  %1751 = vmatmul.mubr.msk.f32.gmra.mrb[28].mxu1 %vm265_vm0, %v455_v2 }
  0xb1   : > { %1705 = vmatprep.mubr.msk.f32.mxu0 %vm265_vm0, %v424_v3  ;;  %1753 = vmatprep.mubr.msk.f32.mxu1 %vm265_vm0, %v456_v4  ;;  %v338_v4 = vld [vmem:[#allocation2 + $0x40] sm:$0xff] }
  0xb4   : > { %1706 = vmatmul.mubr.msk.f32.gmra.mrb[30].mxu0 %vm265_vm0, %v425_v5  ;;  %1754 = vmatmul.mubr.msk.f32.gmra.mrb[30].mxu1 %vm265_vm0, %v457_v6 }
 0x14b   : > { %v1662_v11 = vpop.f32.mrb[0].mxu0  ;;  %v1710_v12 = vpop.f32.mrb[0].mxu1 }
 0x14c   : > { %v1041_v13 = vadd.f32 %v1662_v11, %v331_v7  ;;  %v1073_v14 = vadd.f32 %v1710_v12, %v363_v8  ;;  %v721_v15 = vpop.f32.mrb[1].mxu0  ;;  %v881_v16 = vpop.f32.mrb[1].mxu1 }
 0x14d   : > { %v1040_v17 = vadd.f32 %v721_v15, %v330_v9  ;;  %v1072_v18 = vadd.f32 %v881_v16, %v362_v10  ;;  %v370_v9 = vld [vmem:[#allocation2 + $0x140] sm:$0xff] }
 0x14e   : > { %1105 = vst.msk [vmem:[#allocation2 + $0x8] sm:$0xff] %vm265_vm0, %v1041_v13  ;;  %1137 = vst.msk [vmem:[#allocation2 + $0x108] sm:$0xff] %vm265_vm0, %v1073_v14 }
 0x14f   : > { %1104 = vst.msk [vmem:[#allocation2] sm:$0xff] %vm265_vm0, %v1040_v17  ;;  %1136 = vst.msk [vmem:[#allocation2 + $0x100] sm:$0xff] %vm265_vm0, %v1072_v18  ;;  %v1665_v23 = vpop.f32.mrb[2].mxu0  ;;  %v1713_v24 = vpop.f32.mrb[2].mxu1  ;;  %v341_v18 = vld [vmem:[#allocation2 + $0x58] sm:$0xff] }
 0x150   : > { %v1043_v25 = vadd.f32 %v1665_v23, %v333_v19  ;;  %v1075_v26 = vadd.f32 %v1713_v24, %v365_v20  ;;  %v731_v27 = vpop.f32.mrb[3].mxu0  ;;  %v891_v28 = vpop.f32.mrb[3].mxu1  ;;  %v373_v19 = vld [vmem:[#allocation2 + $0x158] sm:$0xff]  ;;  %v340_v24 = vld [vmem:[#allocation2 + $0x50] sm:$0xff] }
 0x151   : > { %v1042_v29 = vadd.f32 %v731_v27, %v332_v21  ;;  %v1074_v30 = vadd.f32 %v891_v28, %v364_v22 }
 0x152   : > { %1107 = vst.msk [vmem:[#allocation2 + $0x18] sm:$0xff] %vm265_vm0, %v1043_v25  ;;  %1139 = vst.msk [vmem:[#allocation2 + $0x118] sm:$0xff] %vm265_vm0, %v1075_v26 }
 0x153   : > { %1106 = vst.msk [vmem:[#allocation2 + $0x10] sm:$0xff] %vm265_vm0, %v1042_v29  ;;  %1138 = vst.msk [vmem:[#allocation2 + $0x110] sm:$0xff] %vm265_vm0, %v1074_v30  ;;  %v1668_v36 = vpop.f32.mrb[4].mxu0  ;;  %v1716_v37 = vpop.f32.mrb[4].mxu1  ;;  %v372_v29 = vld [vmem:[#allocation2 + $0x150] sm:$0xff] }
 0x154   : > { %v1045_v38 = vadd.f32 %v1668_v36, %v335_v31  ;;  %v1077_v39 = vadd.f32 %v1716_v37, %v367_v32  ;;  %v741_v40 = vpop.f32.mrb[5].mxu0  ;;  %v901_v41 = vpop.f32.mrb[5].mxu1 }
 0x155   : > { %v1172_v44 = vld [vmem:[#allocation2 + $0x8] sm:$0xff]  ;;  %v1044_v46 = vadd.f32 %v741_v40, %v334_v33  ;;  %v1076_v47 = vadd.f32 %v901_v41, %v366_v34 }
 0x156   : > { %v1204_v45 = vld [vmem:[#allocation2 + $0x108] sm:$0xff]  ;;  %v1243_v49 = vadd.f32 %v2532_v35, %v1172_v44  ;;  %v1171_v51 = vld [vmem:[#allocation2] sm:$0xff]  ;;  %1109 = vst.msk [vmem:[#allocation2 + $0x28] sm:$0xff] %vm265_vm0, %v1045_v38  ;;  %1141 = vst.msk [vmem:[#allocation2 + $0x128] sm:$0xff] %vm265_vm0, %v1077_v39 }
 0x157   : > { %v1275_v50 = vadd.f32 %v2532_v35, %v1204_v45  ;;  %v1203_v52 = vld [vmem:[#allocation2 + $0x100] sm:$0xff]  ;;  %v1242_v54 = vadd.f32 %v2532_v35, %v1171_v51  ;;  %1108 = vst.msk [vmem:[#allocation2 + $0x20] sm:$0xff] %vm265_vm0, %v1044_v46  ;;  %1140 = vst.msk [vmem:[#allocation2 + $0x120] sm:$0xff] %vm265_vm0, %v1076_v47  ;;  %v1671_v56 = vpop.f32.mrb[6].mxu0  ;;  %v1719_v57 = vpop.f32.mrb[6].mxu1  ;;  %v343_v39 = vld [vmem:[#allocation2 + $0x68] sm:$0xff] }
 0x158   : > { %v1274_v55 = vadd.f32 %v2532_v35, %v1203_v52  ;;  %1307 = vst.msk [vmem:[%s2546_s20 + $0x8] sm:$0xff] %vm265_vm0, %v1243_v49  ;;  %v1047_v58 = vadd.f32 %v1671_v56, %v337_v42  ;;  %v1079_v59 = vadd.f32 %v1719_v57, %v369_v43  ;;  %v751_v60 = vpop.f32.mrb[7].mxu0  ;;  %v911_v61 = vpop.f32.mrb[7].mxu1  ;;  %v375_v40 = vld [vmem:[#allocation2 + $0x168] sm:$0xff]  ;;  %v342_v45 = vld [vmem:[#allocation2 + $0x60] sm:$0xff] }
 0x159   : > { %1339 = vst.msk [vmem:[%s2546_s20 + $0x108] sm:$0xff] %vm265_vm0, %v1275_v50  ;;  %1306 = vst.msk [vmem:[%s2546_s20] sm:$0xff] %vm265_vm0, %v1242_v54  ;;  %v1174_v0 = vld [vmem:[#allocation2 + $0x18] sm:$0xff]  ;;  %v1046_v2 = vadd.f32 %v751_v60, %v336_v48  ;;  %v1078_v3 = vadd.f32 %v911_v61, %v368_v53  ;;  %v374_v50 = vld [vmem:[#allocation2 + $0x160] sm:$0xff] }
 0x15a   : > { %1338 = vst.msk [vmem:[%s2546_s20 + $0x100] sm:$0xff] %vm265_vm0, %v1274_v55  ;;  %v1206_v1 = vld [vmem:[#allocation2 + $0x118] sm:$0xff]  ;;  %v1245_v5 = vadd.f32 %v2532_v35, %v1174_v0  ;;  %v1173_v7 = vld [vmem:[#allocation2 + $0x10] sm:$0xff]  ;;  %1111 = vst.msk [vmem:[#allocation2 + $0x38] sm:$0xff] %vm265_vm0, %v1047_v58 }
 0x15b   : > { %v1277_v6 = vadd.f32 %v2532_v35, %v1206_v1  ;;  %v1205_v8 = vld [vmem:[#allocation2 + $0x110] sm:$0xff]  ;;  %1143 = vst.msk [vmem:[#allocation2 + $0x138] sm:$0xff] %vm265_vm0, %v1079_v59  ;;  %v1244_v10 = vadd.f32 %v2532_v35, %v1173_v7  ;;  %1110 = vst.msk [vmem:[#allocation2 + $0x30] sm:$0xff] %vm265_vm0, %v1046_v2  ;;  %v1674_v12 = vpop.f32.mrb[8].mxu0  ;;  %v1722_v13 = vpop.f32.mrb[8].mxu1  ;;  %v345_v59 = vld [vmem:[#allocation2 + $0x78] sm:$0xff] }
 0x15c   : > { %v1276_v11 = vadd.f32 %v2532_v35, %v1205_v8  ;;  %1142 = vst.msk [vmem:[#allocation2 + $0x130] sm:$0xff] %vm265_vm0, %v1078_v3  ;;  %1309 = vst.msk [vmem:[%s2546_s20 + $0x18] sm:$0xff] %vm265_vm0, %v1245_v5  ;;  %v1049_v14 = vadd.f32 %v1674_v12, %v339_v62  ;;  %v1081_v15 = vadd.f32 %v1722_v13, %v371_v63  ;;  %v761_v16 = vpop.f32.mrb[9].mxu0  ;;  %v921_v17 = vpop.f32.mrb[9].mxu1  ;;  %v377_v60 = vld [vmem:[#allocation2 + $0x178] sm:$0xff]  ;;  %v344_v1 = vld [vmem:[#allocation2 + $0x70] sm:$0xff] }
 0x15d   : > { %1341 = vst.msk [vmem:[%s2546_s20 + $0x118] sm:$0xff] %vm265_vm0, %v1277_v6  ;;  %1308 = vst.msk [vmem:[%s2546_s20 + $0x10] sm:$0xff] %vm265_vm0, %v1244_v10  ;;  %v1176_v20 = vld [vmem:[#allocation2 + $0x28] sm:$0xff]  ;;  %v1048_v22 = vadd.f32 %v761_v16, %v338_v4  ;;  %v1080_v23 = vadd.f32 %v921_v17, %v370_v9  ;;  %v376_v6 = vld [vmem:[#allocation2 + $0x170] sm:$0xff] }
 0x15e   : > { %1340 = vst.msk [vmem:[%s2546_s20 + $0x110] sm:$0xff] %vm265_vm0, %v1276_v11  ;;  %v1208_v21 = vld [vmem:[#allocation2 + $0x128] sm:$0xff]  ;;  %v1247_v25 = vadd.f32 %v2532_v35, %v1176_v20  ;;  %v1175_v27 = vld [vmem:[#allocation2 + $0x20] sm:$0xff]  ;;  %1113 = vst.msk [vmem:[#allocation2 + $0x48] sm:$0xff] %vm265_vm0, %v1049_v14 }
 0x15f   : > { %v1279_v26 = vadd.f32 %v2532_v35, %v1208_v21  ;;  %v1207_v28 = vld [vmem:[#allocation2 + $0x120] sm:$0xff]  ;;  %1145 = vst.msk [vmem:[#allocation2 + $0x148] sm:$0xff] %vm265_vm0, %v1081_v15  ;;  %v1246_v30 = vadd.f32 %v2532_v35, %v1175_v27  ;;  %1112 = vst.msk [vmem:[#allocation2 + $0x40] sm:$0xff] %vm265_vm0, %v1048_v22  ;;  %v1677_v32 = vpop.f32.mrb[10].mxu0  ;;  %v1725_v33 = vpop.f32.mrb[10].mxu1  ;;  %v347_v15 = vld [vmem:[#allocation2 + $0x88] sm:$0xff] }
 0x160   : > { %v1278_v31 = vadd.f32 %v2532_v35, %v1207_v28  ;;  %1144 = vst.msk [vmem:[#allocation2 + $0x140] sm:$0xff] %vm265_vm0, %v1080_v23  ;;  %1311 = vst.msk [vmem:[%s2546_s20 + $0x28] sm:$0xff] %vm265_vm0, %v1247_v25  ;;  %v1051_v34 = vadd.f32 %v1677_v32, %v341_v18  ;;  %v1083_v36 = vadd.f32 %v1725_v33, %v373_v19  ;;  %v771_v37 = vpop.f32.mrb[11].mxu0  ;;  %v931_v38 = vpop.f32.mrb[11].mxu1  ;;  %v379_v16 = vld [vmem:[#allocation2 + $0x188] sm:$0xff]  ;;  %v346_v21 = vld [vmem:[#allocation2 + $0x80] sm:$0xff] }
 0x161   : > { %1343 = vst.msk [vmem:[%s2546_s20 + $0x128] sm:$0xff] %vm265_vm0, %v1279_v26  ;;  %1310 = vst.msk [vmem:[%s2546_s20 + $0x20] sm:$0xff] %vm265_vm0, %v1246_v30  ;;  %v1178_v41 = vld [vmem:[#allocation2 + $0x38] sm:$0xff]  ;;  %v1050_v43 = vadd.f32 %v771_v37, %v340_v24  ;;  %v1082_v44 = vadd.f32 %v931_v38, %v372_v29  ;;  %v378_v26 = vld [vmem:[#allocation2 + $0x180] sm:$0xff] }
 0x162   : > { %1342 = vst.msk [vmem:[%s2546_s20 + $0x120] sm:$0xff] %vm265_vm0, %v1278_v31  ;;  %v1210_v42 = vld [vmem:[#allocation2 + $0x138] sm:$0xff]  ;;  %v1249_v46 = vadd.f32 %v2532_v35, %v1178_v41  ;;  %v1177_v48 = vld [vmem:[#allocation2 + $0x30] sm:$0xff]  ;;  %1115 = vst.msk [vmem:[#allocation2 + $0x58] sm:$0xff] %vm265_vm0, %v1051_v34 }
 0x163   : > { %v1281_v47 = vadd.f32 %v2532_v35, %v1210_v42  ;;  %v1209_v49 = vld [vmem:[#allocation2 + $0x130] sm:$0xff]  ;;  %1147 = vst.msk [vmem:[#allocation2 + $0x158] sm:$0xff] %vm265_vm0, %v1083_v36  ;;  %v1248_v51 = vadd.f32 %v2532_v35, %v1177_v48  ;;  %1114 = vst.msk [vmem:[#allocation2 + $0x50] sm:$0xff] %vm265_vm0, %v1050_v43  ;;  %v1680_v53 = vpop.f32.mrb[12].mxu0  ;;  %v1728_v54 = vpop.f32.mrb[12].mxu1  ;;  %v349_v36 = vld [vmem:[#allocation2 + $0x98] sm:$0xff] }
 0x164   : > { %v1280_v52 = vadd.f32 %v2532_v35, %v1209_v49  ;;  %1146 = vst.msk [vmem:[#allocation2 + $0x150] sm:$0xff] %vm265_vm0, %v1082_v44  ;;  %1313 = vst.msk [vmem:[%s2546_s20 + $0x38] sm:$0xff] %vm265_vm0, %v1249_v46  ;;  %v1053_v55 = vadd.f32 %v1680_v53, %v343_v39  ;;  %v1085_v56 = vadd.f32 %v1728_v54, %v375_v40  ;;  %v781_v57 = vpop.f32.mrb[13].mxu0  ;;  %v941_v58 = vpop.f32.mrb[13].mxu1  ;;  %v381_v37 = vld [vmem:[#allocation2 + $0x198] sm:$0xff]  ;;  %v348_v42 = vld [vmem:[#allocation2 + $0x90] sm:$0xff] }
 0x165   : > { %1345 = vst.msk [vmem:[%s2546_s20 + $0x138] sm:$0xff] %vm265_vm0, %v1281_v47  ;;  %1312 = vst.msk [vmem:[%s2546_s20 + $0x30] sm:$0xff] %vm265_vm0, %v1248_v51  ;;  %v1180_v61 = vld [vmem:[#allocation2 + $0x48] sm:$0xff]  ;;  %v1052_v63 = vadd.f32 %v781_v57, %v342_v45  ;;  %v1084_v0 = vadd.f32 %v941_v58, %v374_v50  ;;  %v380_v47 = vld [vmem:[#allocation2 + $0x190] sm:$0xff] }
 0x166   : > { %1344 = vst.msk [vmem:[%s2546_s20 + $0x130] sm:$0xff] %vm265_vm0, %v1280_v52  ;;  %v1212_v62 = vld [vmem:[#allocation2 + $0x148] sm:$0xff]  ;;  %v1251_v2 = vadd.f32 %v2532_v35, %v1180_v61  ;;  %v1179_v4 = vld [vmem:[#allocation2 + $0x40] sm:$0xff]  ;;  %1117 = vst.msk [vmem:[#allocation2 + $0x68] sm:$0xff] %vm265_vm0, %v1053_v55 }
 0x167   : > { %v1283_v3 = vadd.f32 %v2532_v35, %v1212_v62  ;;  %v1211_v5 = vld [vmem:[#allocation2 + $0x140] sm:$0xff]  ;;  %1149 = vst.msk [vmem:[#allocation2 + $0x168] sm:$0xff] %vm265_vm0, %v1085_v56  ;;  %v1250_v7 = vadd.f32 %v2532_v35, %v1179_v4  ;;  %1116 = vst.msk [vmem:[#allocation2 + $0x60] sm:$0xff] %vm265_vm0, %v1052_v63  ;;  %v1683_v9 = vpop.f32.mrb[14].mxu0  ;;  %v1731_v10 = vpop.f32.mrb[14].mxu1  ;;  %v351_v56 = vld [vmem:[#allocation2 + $0xa8] sm:$0xff] }
 0x168   : > { %v1282_v8 = vadd.f32 %v2532_v35, %v1211_v5  ;;  %1148 = vst.msk [vmem:[#allocation2 + $0x160] sm:$0xff] %vm265_vm0, %v1084_v0  ;;  %1315 = vst.msk [vmem:[%s2546_s20 + $0x48] sm:$0xff] %vm265_vm0, %v1251_v2  ;;  %v1055_v11 = vadd.f32 %v1683_v9, %v345_v59  ;;  %v1087_v12 = vadd.f32 %v1731_v10, %v377_v60  ;;  %v791_v13 = vpop.f32.mrb[15].mxu0  ;;  %v951_v14 = vpop.f32.mrb[15].mxu1  ;;  %v383_v57 = vld [vmem:[#allocation2 + $0x1a8] sm:$0xff]  ;;  %v350_v62 = vld [vmem:[#allocation2 + $0xa0] sm:$0xff] }
 0x169   : > { %1347 = vst.msk [vmem:[%s2546_s20 + $0x148] sm:$0xff] %vm265_vm0, %v1283_v3  ;;  %1314 = vst.msk [vmem:[%s2546_s20 + $0x40] sm:$0xff] %vm265_vm0, %v1250_v7  ;;  %v1182_v17 = vld [vmem:[#allocation2 + $0x58] sm:$0xff]  ;;  %v1054_v19 = vadd.f32 %v791_v13, %v344_v1  ;;  %v1086_v20 = vadd.f32 %v951_v14, %v376_v6  ;;  %v382_v3 = vld [vmem:[#allocation2 + $0x1a0] sm:$0xff] }
 0x16a   : > { %1346 = vst.msk [vmem:[%s2546_s20 + $0x140] sm:$0xff] %vm265_vm0, %v1282_v8  ;;  %v1214_v18 = vld [vmem:[#allocation2 + $0x158] sm:$0xff]  ;;  %v1253_v22 = vadd.f32 %v2532_v35, %v1182_v17  ;;  %v1181_v24 = vld [vmem:[#allocation2 + $0x50] sm:$0xff]  ;;  %1119 = vst.msk [vmem:[#allocation2 + $0x78] sm:$0xff] %vm265_vm0, %v1055_v11 }
 0x16b   : > { %v1285_v23 = vadd.f32 %v2532_v35, %v1214_v18  ;;  %v1213_v25 = vld [vmem:[#allocation2 + $0x150] sm:$0xff]  ;;  %1151 = vst.msk [vmem:[#allocation2 + $0x178] sm:$0xff] %vm265_vm0, %v1087_v12  ;;  %v1252_v27 = vadd.f32 %v2532_v35, %v1181_v24  ;;  %1118 = vst.msk [vmem:[#allocation2 + $0x70] sm:$0xff] %vm265_vm0, %v1054_v19  ;;  %v1686_v29 = vpop.f32.mrb[16].mxu0  ;;  %v1734_v30 = vpop.f32.mrb[16].mxu1  ;;  %v353_v12 = vld [vmem:[#allocation2 + $0xb8] sm:$0xff] }
 0x16c   : > { %v1284_v28 = vadd.f32 %v2532_v35, %v1213_v25  ;;  %1150 = vst.msk [vmem:[#allocation2 + $0x170] sm:$0xff] %vm265_vm0, %v1086_v20  ;;  %1317 = vst.msk [vmem:[%s2546_s20 + $0x58] sm:$0xff] %vm265_vm0, %v1253_v22  ;;  %v1057_v31 = vadd.f32 %v1686_v29, %v347_v15  ;;  %v1089_v32 = vadd.f32 %v1734_v30, %v379_v16  ;;  %v801_v33 = vpop.f32.mrb[17].mxu0  ;;  %v961_v34 = vpop.f32.mrb[17].mxu1  ;;  %v385_v13 = vld [vmem:[#allocation2 + $0x1b8] sm:$0xff]  ;;  %v352_v18 = vld [vmem:[#allocation2 + $0xb0] sm:$0xff] }
 0x16d   : > { %1349 = vst.msk [vmem:[%s2546_s20 + $0x158] sm:$0xff] %vm265_vm0, %v1285_v23  ;;  %1316 = vst.msk [vmem:[%s2546_s20 + $0x50] sm:$0xff] %vm265_vm0, %v1252_v27  ;;  %v1184_v38 = vld [vmem:[#allocation2 + $0x68] sm:$0xff]  ;;  %v1056_v40 = vadd.f32 %v801_v33, %v346_v21  ;;  %v1088_v41 = vadd.f32 %v961_v34, %v378_v26  ;;  %v384_v23 = vld [vmem:[#allocation2 + $0x1b0] sm:$0xff] }
 0x16e   : > { %1348 = vst.msk [vmem:[%s2546_s20 + $0x150] sm:$0xff] %vm265_vm0, %v1284_v28  ;;  %v1216_v39 = vld [vmem:[#allocation2 + $0x168] sm:$0xff]  ;;  %v1255_v43 = vadd.f32 %v2532_v35, %v1184_v38  ;;  %v1183_v45 = vld [vmem:[#allocation2 + $0x60] sm:$0xff]  ;;  %1121 = vst.msk [vmem:[#allocation2 + $0x88] sm:$0xff] %vm265_vm0, %v1057_v31 }
 0x16f   : > { %v1287_v44 = vadd.f32 %v2532_v35, %v1216_v39  ;;  %v1215_v46 = vld [vmem:[#allocation2 + $0x160] sm:$0xff]  ;;  %1153 = vst.msk [vmem:[#allocation2 + $0x188] sm:$0xff] %vm265_vm0, %v1089_v32  ;;  %v1254_v48 = vadd.f32 %v2532_v35, %v1183_v45  ;;  %1120 = vst.msk [vmem:[#allocation2 + $0x80] sm:$0xff] %vm265_vm0, %v1056_v40  ;;  %v1689_v50 = vpop.f32.mrb[18].mxu0  ;;  %v1737_v51 = vpop.f32.mrb[18].mxu1  ;;  %v355_v32 = vld [vmem:[#allocation2 + $0xc8] sm:$0xff] }
 0x170   : > { %v1286_v49 = vadd.f32 %v2532_v35, %v1215_v46  ;;  %1152 = vst.msk [vmem:[#allocation2 + $0x180] sm:$0xff] %vm265_vm0, %v1088_v41  ;;  %1319 = vst.msk [vmem:[%s2546_s20 + $0x68] sm:$0xff] %vm265_vm0, %v1255_v43  ;;  %v1059_v52 = vadd.f32 %v1689_v50, %v349_v36  ;;  %v1091_v53 = vadd.f32 %v1737_v51, %v381_v37  ;;  %v811_v54 = vpop.f32.mrb[19].mxu0  ;;  %v971_v55 = vpop.f32.mrb[19].mxu1  ;;  %v387_v33 = vld [vmem:[#allocation2 + $0x1c8] sm:$0xff]  ;;  %v354_v39 = vld [vmem:[#allocation2 + $0xc0] sm:$0xff] }
 0x171   : > { %1351 = vst.msk [vmem:[%s2546_s20 + $0x168] sm:$0xff] %vm265_vm0, %v1287_v44  ;;  %1318 = vst.msk [vmem:[%s2546_s20 + $0x60] sm:$0xff] %vm265_vm0, %v1254_v48  ;;  %v1186_v58 = vld [vmem:[#allocation2 + $0x78] sm:$0xff]  ;;  %v1058_v60 = vadd.f32 %v811_v54, %v348_v42  ;;  %v1090_v61 = vadd.f32 %v971_v55, %v380_v47  ;;  %v386_v44 = vld [vmem:[#allocation2 + $0x1c0] sm:$0xff] }
 0x172   : > { %1350 = vst.msk [vmem:[%s2546_s20 + $0x160] sm:$0xff] %vm265_vm0, %v1286_v49  ;;  %v1218_v59 = vld [vmem:[#allocation2 + $0x178] sm:$0xff]  ;;  %v1257_v63 = vadd.f32 %v2532_v35, %v1186_v58  ;;  %v1185_v1 = vld [vmem:[#allocation2 + $0x70] sm:$0xff]  ;;  %1123 = vst.msk [vmem:[#allocation2 + $0x98] sm:$0xff] %vm265_vm0, %v1059_v52 }
 0x173   : > { %v1289_v0 = vadd.f32 %v2532_v35, %v1218_v59  ;;  %v1217_v2 = vld [vmem:[#allocation2 + $0x170] sm:$0xff]  ;;  %1155 = vst.msk [vmem:[#allocation2 + $0x198] sm:$0xff] %vm265_vm0, %v1091_v53  ;;  %v1256_v4 = vadd.f32 %v2532_v35, %v1185_v1  ;;  %1122 = vst.msk [vmem:[#allocation2 + $0x90] sm:$0xff] %vm265_vm0, %v1058_v60  ;;  %v1692_v6 = vpop.f32.mrb[20].mxu0  ;;  %v1740_v7 = vpop.f32.mrb[20].mxu1  ;;  %v357_v53 = vld [vmem:[#allocation2 + $0xd8] sm:$0xff] }
 0x174   : > { %v1288_v5 = vadd.f32 %v2532_v35, %v1217_v2  ;;  %1154 = vst.msk [vmem:[#allocation2 + $0x190] sm:$0xff] %vm265_vm0, %v1090_v61  ;;  %1321 = vst.msk [vmem:[%s2546_s20 + $0x78] sm:$0xff] %vm265_vm0, %v1257_v63  ;;  %v1061_v8 = vadd.f32 %v1692_v6, %v351_v56  ;;  %v1093_v9 = vadd.f32 %v1740_v7, %v383_v57  ;;  %v821_v10 = vpop.f32.mrb[21].mxu0  ;;  %v981_v11 = vpop.f32.mrb[21].mxu1  ;;  %v389_v54 = vld [vmem:[#allocation2 + $0x1d8] sm:$0xff]  ;;  %v356_v59 = vld [vmem:[#allocation2 + $0xd0] sm:$0xff] }
 0x175   : > { %1353 = vst.msk [vmem:[%s2546_s20 + $0x178] sm:$0xff] %vm265_vm0, %v1289_v0  ;;  %1320 = vst.msk [vmem:[%s2546_s20 + $0x70] sm:$0xff] %vm265_vm0, %v1256_v4  ;;  %v1188_v14 = vld [vmem:[#allocation2 + $0x88] sm:$0xff]  ;;  %v1060_v16 = vadd.f32 %v821_v10, %v350_v62  ;;  %v1092_v17 = vadd.f32 %v981_v11, %v382_v3  ;;  %v388_v0 = vld [vmem:[#allocation2 + $0x1d0] sm:$0xff] }
 0x176   : > { %1352 = vst.msk [vmem:[%s2546_s20 + $0x170] sm:$0xff] %vm265_vm0, %v1288_v5  ;;  %v1220_v15 = vld [vmem:[#allocation2 + $0x188] sm:$0xff]  ;;  %v1259_v19 = vadd.f32 %v2532_v35, %v1188_v14  ;;  %v1187_v21 = vld [vmem:[#allocation2 + $0x80] sm:$0xff]  ;;  %1125 = vst.msk [vmem:[#allocation2 + $0xa8] sm:$0xff] %vm265_vm0, %v1061_v8 }
 0x177   : > { %v1291_v20 = vadd.f32 %v2532_v35, %v1220_v15  ;;  %v1219_v22 = vld [vmem:[#allocation2 + $0x180] sm:$0xff]  ;;  %1157 = vst.msk [vmem:[#allocation2 + $0x1a8] sm:$0xff] %vm265_vm0, %v1093_v9  ;;  %v1258_v24 = vadd.f32 %v2532_v35, %v1187_v21  ;;  %1124 = vst.msk [vmem:[#allocation2 + $0xa0] sm:$0xff] %vm265_vm0, %v1060_v16  ;;  %v1695_v26 = vpop.f32.mrb[22].mxu0  ;;  %v1743_v27 = vpop.f32.mrb[22].mxu1  ;;  %v359_v9 = vld [vmem:[#allocation2 + $0xe8] sm:$0xff] }
 0x178   : > { %v1290_v25 = vadd.f32 %v2532_v35, %v1219_v22  ;;  %1156 = vst.msk [vmem:[#allocation2 + $0x1a0] sm:$0xff] %vm265_vm0, %v1092_v17  ;;  %1323 = vst.msk [vmem:[%s2546_s20 + $0x88] sm:$0xff] %vm265_vm0, %v1259_v19  ;;  %v1063_v28 = vadd.f32 %v1695_v26, %v353_v12  ;;  %v1095_v29 = vadd.f32 %v1743_v27, %v385_v13  ;;  %v831_v30 = vpop.f32.mrb[23].mxu0  ;;  %v991_v31 = vpop.f32.mrb[23].mxu1  ;;  %v391_v10 = vld [vmem:[#allocation2 + $0x1e8] sm:$0xff]  ;;  %v358_v15 = vld [vmem:[#allocation2 + $0xe0] sm:$0xff] }
 0x179   : > { %1355 = vst.msk [vmem:[%s2546_s20 + $0x188] sm:$0xff] %vm265_vm0, %v1291_v20  ;;  %1322 = vst.msk [vmem:[%s2546_s20 + $0x80] sm:$0xff] %vm265_vm0, %v1258_v24  ;;  %v1190_v34 = vld [vmem:[#allocation2 + $0x98] sm:$0xff]  ;;  %v1062_v37 = vadd.f32 %v831_v30, %v352_v18  ;;  %v1094_v38 = vadd.f32 %v991_v31, %v384_v23  ;;  %v390_v20 = vld [vmem:[#allocation2 + $0x1e0] sm:$0xff] }
 0x17a   : > { %1354 = vst.msk [vmem:[%s2546_s20 + $0x180] sm:$0xff] %vm265_vm0, %v1290_v25  ;;  %v1222_v36 = vld [vmem:[#allocation2 + $0x198] sm:$0xff]  ;;  %v1261_v40 = vadd.f32 %v2532_v35, %v1190_v34  ;;  %v1189_v42 = vld [vmem:[#allocation2 + $0x90] sm:$0xff]  ;;  %1127 = vst.msk [vmem:[#allocation2 + $0xb8] sm:$0xff] %vm265_vm0, %v1063_v28 }
 0x17b   : > { %v1293_v41 = vadd.f32 %v2532_v35, %v1222_v36  ;;  %v1221_v43 = vld [vmem:[#allocation2 + $0x190] sm:$0xff]  ;;  %1159 = vst.msk [vmem:[#allocation2 + $0x1b8] sm:$0xff] %vm265_vm0, %v1095_v29  ;;  %v1260_v45 = vadd.f32 %v2532_v35, %v1189_v42  ;;  %1126 = vst.msk [vmem:[#allocation2 + $0xb0] sm:$0xff] %vm265_vm0, %v1062_v37  ;;  %v1698_v47 = vpop.f32.mrb[24].mxu0  ;;  %v1746_v48 = vpop.f32.mrb[24].mxu1  ;;  %v361_v29 = vld [vmem:[#allocation2 + $0xf8] sm:$0xff] }
 0x17c   : > { %v1292_v46 = vadd.f32 %v2532_v35, %v1221_v43  ;;  %1158 = vst.msk [vmem:[#allocation2 + $0x1b0] sm:$0xff] %vm265_vm0, %v1094_v38  ;;  %1325 = vst.msk [vmem:[%s2546_s20 + $0x98] sm:$0xff] %vm265_vm0, %v1261_v40  ;;  %v1065_v49 = vadd.f32 %v1698_v47, %v355_v32  ;;  %v1097_v50 = vadd.f32 %v1746_v48, %v387_v33  ;;  %v841_v51 = vpop.f32.mrb[25].mxu0  ;;  %v1001_v52 = vpop.f32.mrb[25].mxu1  ;;  %v393_v30 = vld [vmem:[#allocation2 + $0x1f8] sm:$0xff]  ;;  %v360_v36 = vld [vmem:[#allocation2 + $0xf0] sm:$0xff] }
 0x17d   : > { %1357 = vst.msk [vmem:[%s2546_s20 + $0x198] sm:$0xff] %vm265_vm0, %v1293_v41  ;;  %1324 = vst.msk [vmem:[%s2546_s20 + $0x90] sm:$0xff] %vm265_vm0, %v1260_v45  ;;  %v1192_v55 = vld [vmem:[#allocation2 + $0xa8] sm:$0xff]  ;;  %v1064_v57 = vadd.f32 %v841_v51, %v354_v39  ;;  %v1096_v58 = vadd.f32 %v1001_v52, %v386_v44  ;;  %v392_v41 = vld [vmem:[#allocation2 + $0x1f0] sm:$0xff] }
 0x17e   : > { %1356 = vst.msk [vmem:[%s2546_s20 + $0x190] sm:$0xff] %vm265_vm0, %v1292_v46  ;;  %v1224_v56 = vld [vmem:[#allocation2 + $0x1a8] sm:$0xff]  ;;  %v1263_v60 = vadd.f32 %v2532_v35, %v1192_v55  ;;  %v1191_v62 = vld [vmem:[#allocation2 + $0xa0] sm:$0xff]  ;;  %1129 = vst.msk [vmem:[#allocation2 + $0xc8] sm:$0xff] %vm265_vm0, %v1065_v49 }
 0x17f   : > { %v1295_v61 = vadd.f32 %v2532_v35, %v1224_v56  ;;  %v1223_v63 = vld [vmem:[#allocation2 + $0x1a0] sm:$0xff]  ;;  %1161 = vst.msk [vmem:[#allocation2 + $0x1c8] sm:$0xff] %vm265_vm0, %v1097_v50  ;;  %v1262_v1 = vadd.f32 %v2532_v35, %v1191_v62  ;;  %1128 = vst.msk [vmem:[#allocation2 + $0xc0] sm:$0xff] %vm265_vm0, %v1064_v57  ;;  %v1701_v3 = vpop.f32.mrb[26].mxu0  ;;  %v1749_v4 = vpop.f32.mrb[26].mxu1 }
 0x180   : > { %v1294_v2 = vadd.f32 %v2532_v35, %v1223_v63  ;;  %1160 = vst.msk [vmem:[#allocation2 + $0x1c0] sm:$0xff] %vm265_vm0, %v1096_v58  ;;  %1327 = vst.msk [vmem:[%s2546_s20 + $0xa8] sm:$0xff] %vm265_vm0, %v1263_v60  ;;  %v1067_v5 = vadd.f32 %v1701_v3, %v357_v53  ;;  %v1099_v6 = vadd.f32 %v1749_v4, %v389_v54  ;;  %v851_v7 = vpop.f32.mrb[27].mxu0  ;;  %v1011_v8 = vpop.f32.mrb[27].mxu1 }
 0x181   : > { %1359 = vst.msk [vmem:[%s2546_s20 + $0x1a8] sm:$0xff] %vm265_vm0, %v1295_v61  ;;  %1326 = vst.msk [vmem:[%s2546_s20 + $0xa0] sm:$0xff] %vm265_vm0, %v1262_v1  ;;  %v1194_v11 = vld [vmem:[#allocation2 + $0xb8] sm:$0xff]  ;;  %v1066_v13 = vadd.f32 %v851_v7, %v356_v59  ;;  %v1098_v14 = vadd.f32 %v1011_v8, %v388_v0 }
 0x182   : > { %1358 = vst.msk [vmem:[%s2546_s20 + $0x1a0] sm:$0xff] %vm265_vm0, %v1294_v2  ;;  %v1226_v12 = vld [vmem:[#allocation2 + $0x1b8] sm:$0xff]  ;;  %v1265_v16 = vadd.f32 %v2532_v35, %v1194_v11  ;;  %v1193_v18 = vld [vmem:[#allocation2 + $0xb0] sm:$0xff]  ;;  %1131 = vst.msk [vmem:[#allocation2 + $0xd8] sm:$0xff] %vm265_vm0, %v1067_v5 }
 0x183   : > { %v1297_v17 = vadd.f32 %v2532_v35, %v1226_v12  ;;  %v1225_v19 = vld [vmem:[#allocation2 + $0x1b0] sm:$0xff]  ;;  %1163 = vst.msk [vmem:[#allocation2 + $0x1d8] sm:$0xff] %vm265_vm0, %v1099_v6  ;;  %v1264_v21 = vadd.f32 %v2532_v35, %v1193_v18  ;;  %1130 = vst.msk [vmem:[#allocation2 + $0xd0] sm:$0xff] %vm265_vm0, %v1066_v13  ;;  %v1704_v23 = vpop.f32.mrb[28].mxu0  ;;  %v1752_v24 = vpop.f32.mrb[28].mxu1 }
 0x184   : > { %v1296_v22 = vadd.f32 %v2532_v35, %v1225_v19  ;;  %1162 = vst.msk [vmem:[#allocation2 + $0x1d0] sm:$0xff] %vm265_vm0, %v1098_v14  ;;  %1329 = vst.msk [vmem:[%s2546_s20 + $0xb8] sm:$0xff] %vm265_vm0, %v1265_v16  ;;  %v1069_v25 = vadd.f32 %v1704_v23, %v359_v9  ;;  %v1101_v26 = vadd.f32 %v1752_v24, %v391_v10  ;;  %v861_v27 = vpop.f32.mrb[29].mxu0  ;;  %v1021_v28 = vpop.f32.mrb[29].mxu1 }
 0x185   : > { %1361 = vst.msk [vmem:[%s2546_s20 + $0x1b8] sm:$0xff] %vm265_vm0, %v1297_v17  ;;  %1328 = vst.msk [vmem:[%s2546_s20 + $0xb0] sm:$0xff] %vm265_vm0, %v1264_v21  ;;  %v1196_v31 = vld [vmem:[#allocation2 + $0xc8] sm:$0xff]  ;;  %v1068_v33 = vadd.f32 %v861_v27, %v358_v15  ;;  %v1100_v34 = vadd.f32 %v1021_v28, %v390_v20 }
 0x186   : > { %1360 = vst.msk [vmem:[%s2546_s20 + $0x1b0] sm:$0xff] %vm265_vm0, %v1296_v22  ;;  %v1228_v32 = vld [vmem:[#allocation2 + $0x1c8] sm:$0xff]  ;;  %v1267_v37 = vadd.f32 %v2532_v35, %v1196_v31  ;;  %v1195_v39 = vld [vmem:[#allocation2 + $0xc0] sm:$0xff]  ;;  %1133 = vst.msk [vmem:[#allocation2 + $0xe8] sm:$0xff] %vm265_vm0, %v1069_v25 }
 0x187   : > { %v1299_v38 = vadd.f32 %v2532_v35, %v1228_v32  ;;  %v1227_v40 = vld [vmem:[#allocation2 + $0x1c0] sm:$0xff]  ;;  %1165 = vst.msk [vmem:[#allocation2 + $0x1e8] sm:$0xff] %vm265_vm0, %v1101_v26  ;;  %v1266_v42 = vadd.f32 %v2532_v35, %v1195_v39  ;;  %1132 = vst.msk [vmem:[#allocation2 + $0xe0] sm:$0xff] %vm265_vm0, %v1068_v33  ;;  %v1707_v44 = vpop.f32.mrb[30].mxu0  ;;  %v1755_v45 = vpop.f32.mrb[30].mxu1 }
 0x188   : > { %v1298_v43 = vadd.f32 %v2532_v35, %v1227_v40  ;;  %1164 = vst.msk [vmem:[#allocation2 + $0x1e0] sm:$0xff] %vm265_vm0, %v1100_v34  ;;  %1331 = vst.msk [vmem:[%s2546_s20 + $0xc8] sm:$0xff] %vm265_vm0, %v1267_v37  ;;  %v1071_v46 = vadd.f32 %v1707_v44, %v361_v29  ;;  %v1103_v47 = vadd.f32 %v1755_v45, %v393_v30  ;;  %v871_v48 = vpop.f32.mrb[31].mxu0  ;;  %v1031_v49 = vpop.f32.mrb[31].mxu1 }
 0x189   : > { %1363 = vst.msk [vmem:[%s2546_s20 + $0x1c8] sm:$0xff] %vm265_vm0, %v1299_v38  ;;  %1330 = vst.msk [vmem:[%s2546_s20 + $0xc0] sm:$0xff] %vm265_vm0, %v1266_v42  ;;  %v1198_v50 = vld [vmem:[#allocation2 + $0xd8] sm:$0xff]  ;;  %v1070_v52 = vadd.f32 %v871_v48, %v360_v36  ;;  %v1102_v53 = vadd.f32 %v1031_v49, %v392_v41 }
 0x18a   : > { %1362 = vst.msk [vmem:[%s2546_s20 + $0x1c0] sm:$0xff] %vm265_vm0, %v1298_v43  ;;  %v1230_v51 = vld [vmem:[#allocation2 + $0x1d8] sm:$0xff]  ;;  %v1269_v54 = vadd.f32 %v2532_v35, %v1198_v50  ;;  %v1197_v56 = vld [vmem:[#allocation2 + $0xd0] sm:$0xff]  ;;  %1135 = vst.msk [vmem:[#allocation2 + $0xf8] sm:$0xff] %vm265_vm0, %v1071_v46 }
 0x18b   : > { %v1301_v55 = vadd.f32 %v2532_v35, %v1230_v51  ;;  %v1229_v57 = vld [vmem:[#allocation2 + $0x1d0] sm:$0xff]  ;;  %1167 = vst.msk [vmem:[#allocation2 + $0x1f8] sm:$0xff] %vm265_vm0, %v1103_v47  ;;  %v1268_v58 = vadd.f32 %v2532_v35, %v1197_v56  ;;  %1134 = vst.msk [vmem:[#allocation2 + $0xf0] sm:$0xff] %vm265_vm0, %v1070_v52 }
 0x18c   : > { %v1300_v59 = vadd.f32 %v2532_v35, %v1229_v57  ;;  %1166 = vst.msk [vmem:[#allocation2 + $0x1f0] sm:$0xff] %vm265_vm0, %v1102_v53  ;;  %1333 = vst.msk [vmem:[%s2546_s20 + $0xd8] sm:$0xff] %vm265_vm0, %v1269_v54 }
 0x18d   : > { %1365 = vst.msk [vmem:[%s2546_s20 + $0x1d8] sm:$0xff] %vm265_vm0, %v1301_v55  ;;  %1332 = vst.msk [vmem:[%s2546_s20 + $0xd0] sm:$0xff] %vm265_vm0, %v1268_v58  ;;  %v1200_v60 = vld [vmem:[#allocation2 + $0xe8] sm:$0xff] }
 0x18e   : > { %1364 = vst.msk [vmem:[%s2546_s20 + $0x1d0] sm:$0xff] %vm265_vm0, %v1300_v59  ;;  %v1232_v61 = vld [vmem:[#allocation2 + $0x1e8] sm:$0xff]  ;;  %v1271_v62 = vadd.f32 %v2532_v35, %v1200_v60  ;;  %v1199_v0 = vld [vmem:[#allocation2 + $0xe0] sm:$0xff] }
 0x18f   : > { %v1303_v63 = vadd.f32 %v2532_v35, %v1232_v61  ;;  %v1231_v1 = vld [vmem:[#allocation2 + $0x1e0] sm:$0xff]  ;;  %v1270_v2 = vadd.f32 %v2532_v35, %v1199_v0 }
 0x190   : > { %v1302_v3 = vadd.f32 %v2532_v35, %v1231_v1  ;;  %1335 = vst.msk [vmem:[%s2546_s20 + $0xe8] sm:$0xff] %vm265_vm0, %v1271_v62 }
 0x191   : > { %1367 = vst.msk [vmem:[%s2546_s20 + $0x1e8] sm:$0xff] %vm265_vm0, %v1303_v63  ;;  %1334 = vst.msk [vmem:[%s2546_s20 + $0xe0] sm:$0xff] %vm265_vm0, %v1270_v2  ;;  %v1202_v4 = vld [vmem:[#allocation2 + $0xf8] sm:$0xff] }
 0x192   : > { %1366 = vst.msk [vmem:[%s2546_s20 + $0x1e0] sm:$0xff] %vm265_vm0, %v1302_v3  ;;  %v1234_v5 = vld [vmem:[#allocation2 + $0x1f8] sm:$0xff]  ;;  %v1273_v6 = vadd.f32 %v2532_v35, %v1202_v4  ;;  %v1201_v8 = vld [vmem:[#allocation2 + $0xf0] sm:$0xff] }
 0x193   : > { %v1305_v7 = vadd.f32 %v2532_v35, %v1234_v5  ;;  %v1233_v9 = vld [vmem:[#allocation2 + $0x1f0] sm:$0xff]  ;;  %v1272_v10 = vadd.f32 %v2532_v35, %v1201_v8 }
 0x194   : > { %v1304_v11 = vadd.f32 %v2532_v35, %v1233_v9  ;;  %1337 = vst.msk [vmem:[%s2546_s20 + $0xf8] sm:$0xff] %vm265_vm0, %v1273_v6 }
 0x195   : > { %1369 = vst.msk [vmem:[%s2546_s20 + $0x1f8] sm:$0xff] %vm265_vm0, %v1305_v7  ;;  %1336 = vst.msk [vmem:[%s2546_s20 + $0xf0] sm:$0xff] %vm265_vm0, %v1272_v10 }
 0x196   : > { %1368 = vst.msk [vmem:[%s2546_s20 + $0x1f0] sm:$0xff] %vm265_vm0, %v1304_v11 }
 0x197   : > { %1955 = shalt.err (!%p1952_p11)
}
 0x198   : > { %s1956_s21 = scalar_lea.hbm %s2783_s18, 8192  ;;  %s1960_s5 = scalar_lea.hbm %s2847_s3, 16384 }
 0x199   : > { %p1957_p0 = scmp.ne.s32.totalorder %s2783_s18, %s1956_s21  ;;  %p1961_p6 = scmp.lt.u32.totalorder %s2783_s18, %s2847_s3 }
 0x19a   : > { %p1962_p7 = scmp.lt.u32.totalorder %s1960_s5, %s1956_s21  ;;  %p1964_p8 = scmp.lt.u32.totalorder %s1956_s21, %s2783_s18 }
 0x19b   : > { %p1958_p4 = pnand %p1957_p0, %p2862_p12 }
 0x19c   : > { %p1963_p2 = por %p1962_p7, %p1961_p6 }
 0x19d   : > { %p1959_p13 = pneg %p1958_p4 }
 0x19e   : > { %p1965_p1 = por %p1964_p8, %p1963_p2 }
 0x1a0   : > { %p1966_p10 = pnand %p1965_p1, %p1959_p13 }
 0x1a2   : > { %1969 = shalt.err (!%p1966_p10)
}
 0x1a3   : > { %s2037_s20 = smov 128   ;;  %s2038_s22 = smov 8  }
 0x1a4   : > { %1778 = dma.vmem_to_hbm [thread:$0]  (%p2862_p12), %s2785_s24, 8192, %s2783_s18, %s1371_s26, %s2037_s20, %s2037_s20, %s2038_s22  }
 0x1a5 PF: > { %s1400_s15 = sand.u32 1, %s2008_s12   ;;  %p2863_p3 = scmp.ne.s32.totalorder %s2855_s23, 0 }
 0x1a6   : > { %p2864_p5 = scmp.ge.s32.totalorder %s2028_s17, 2  ;;  %s1401_s11 = scalar_lea.sflag [#allocation5], %s1400_s15 }
 0x1a8   : > { %p1792_p9 = pnand %p2864_p5, %p2863_p3 }
 0x1aa   : > { %2003 = dma.done.wait (!%p1792_p9), %s1401_s11, 8192  }
 0x1ab   : > { %2005 = vsyncadd (!%p1792_p9), %s1401_s11, 4294959104  ;;  %s20_s17 = sadd.s32 1, %s2028_s17   ;;  %s2865_s12 = smov %s2012_s13 }
 0x1ac   : > { %p17_p11 = scmp.ge.s32.totalorder %s20_s17, 4   ;;  %s2866_s13 = smov %s2016_s14 }
 0x1ad   : > { %s2867_s14 = smov %s2205_s6  ;;  %s2868_s15 = smov %s2024_s16 }
 0x1ae   : > { %s2869_s16 = smov %s2871_s25  ;;  %19 = sbr.rel (!%p17_p11) target bundleno = 7 (0x7), region = 95 }
 0x1b5   :  { %1406 = vsyncpa [#allocation4], 1 }
 0x1b6   :  { %1408 = vsyncpa [#allocation4 + $0x1], 1 }
 0x1b7   :  { %1409 = vsyncpa [#allocation7], 1 }
 0x1b8   :  { %1410 = vsyncpa [#allocation5], 1 }
 0x1b9   :  { %1412 = vsyncpa [#allocation5 + $0x1], 1 }

</bundles_post_ra>
